<compile_context>
chip_gen: v7x
topology: tpu7x:2x2x1
jax: 0.10.0
libtpu: 0.0.40
codegen_flags: <defaults>
</compile_context>

<pallas_src>
import jax
import jax.numpy as jnp
import numpy as np
from jax.experimental import pallas as pl
from jax.experimental.pallas import tpu as pltpu


def _round_up(x, m):
    return (x + m - 1) // m * m


# --------------------------------------------------------------------------
# Recurrent kernel: one grid step processes a chunk of Tc timesteps.
# --------------------------------------------------------------------------
def lstm_recurrence_kernel(gx_ref, whh_ref, hseq_ref, hn_ref, cn_ref):
    """
    gx_ref   : (Tc, 4, Bp, Hp) f32   precomputed x@W_ih^T + (b_ih+b_hh), gates i,f,g,o
    whh_ref  : (4, Hp, Hp)     bf16  recurrent weights, gate-stacked (no lane slicing)
    hseq_ref : (Tc, Bp, Hp)    bf16  per-step hidden states (decoder input)
    hn_ref   : (Bp, Hp)        f32   hidden-state carry (resident accumulator)
    cn_ref   : (Bp, Hp)        f32   cell-state carry   (resident accumulator)
    """
    t = pl.program_id(0)

    @pl.when(t == 0)
    def _():
        hn_ref[...] = jnp.zeros_like(hn_ref)
        cn_ref[...] = jnp.zeros_like(cn_ref)

    w_i = whh_ref[0]
    w_f = whh_ref[1]
    w_g = whh_ref[2]
    w_o = whh_ref[3]

    tc = gx_ref.shape[0]

    def step(i, carry):
        h, c = carry                        # f32 (Bp, Hp)
        gx = gx_ref[i]                      # (4, Bp, Hp) f32
        hb = h.astype(jnp.bfloat16)
        zi = gx[0] + jnp.dot(hb, w_i, preferred_element_type=jnp.float32)
        zf = gx[1] + jnp.dot(hb, w_f, preferred_element_type=jnp.float32)
        zg = gx[2] + jnp.dot(hb, w_g, preferred_element_type=jnp.float32)
        zo = gx[3] + jnp.dot(hb, w_o, preferred_element_type=jnp.float32)
        i_g = jax.nn.sigmoid(zi)
        f_g = jax.nn.sigmoid(zf)
        g_g = jnp.tanh(zg)
        o_g = jax.nn.sigmoid(zo)
        c_new = f_g * c + i_g * g_g
        h_new = o_g * jnp.tanh(c_new)
        hseq_ref[i] = h_new.astype(hseq_ref.dtype)
        return (h_new, c_new)

    h_fin, c_fin = jax.lax.fori_loop(0, tc, step, (hn_ref[...], cn_ref[...]),
                                     unroll=True)
    hn_ref[...] = h_fin
    cn_ref[...] = c_fin


# --------------------------------------------------------------------------
# Decoder kernel: fully parallel tiled matmul (no sequential dependency).
# --------------------------------------------------------------------------
def decoder_kernel(h_ref, w_ref, b_ref, o_ref):
    o_ref[...] = (jnp.dot(h_ref[...], w_ref[...],
                          preferred_element_type=jnp.float32)
                  + b_ref[...])


# --------------------------------------------------------------------------
# Wrapper
# --------------------------------------------------------------------------
def text_generator_forward(tokens, params, *, time_chunk=8):
    """tokens: (B, T) int32.  Returns (logits (B,T,V), (h_n, c_n)) like torch."""
    emb = params["embedding"]                  # (V_in, E)
    w_ih, w_hh = params["w_ih"], params["w_hh"]        # (4H,E), (4H,H) torch layout
    bias = params["b_ih"] + params["b_hh"]              # (4H,)
    w_dec, b_dec = params["w_dec"], params["b_dec"]     # (V,H), (V,)

    B, T = tokens.shape
    E = emb.shape[1]
    H = w_hh.shape[1]
    V = w_dec.shape[0]

    Bp = _round_up(max(B, 8), 8)      # sublane-pad the batch
    Hp = _round_up(H, 128)            # lane-pad hidden
    Vp = _round_up(V, 128)            # lane-pad vocab -> lane-dense stores

    # --- parameter prep: gate-stacked, zero-padded, bf16 weights -------------
    w_ih_g = jnp.transpose(w_ih.reshape(4, H, E), (0, 2, 1))            # (4,E,H)
    w_ih_g = jnp.pad(w_ih_g, ((0, 0), (0, 0), (0, Hp - H))).astype(jnp.bfloat16)
    w_hh_g = jnp.transpose(w_hh.reshape(4, H, H), (0, 2, 1))            # (4,H,H)
    w_hh_g = jnp.pad(w_hh_g, ((0, 0), (0, Hp - H), (0, Hp - H))).astype(jnp.bfloat16)
    bias_g = jnp.pad(bias.reshape(4, H), ((0, 0), (0, Hp - H)))         # (4,Hp) f32
    w_dec_p = jnp.pad(w_dec.T, ((0, Hp - H), (0, Vp - V))).astype(jnp.bfloat16)
    b_dec_p = jnp.pad(b_dec, (0, Vp - V)).reshape(1, Vp).astype(jnp.float32)

    # --- hoisted input projection: one big parallel matmul (not sequential) --
    x = emb[tokens].astype(jnp.bfloat16)                                # (B,T,E)
    gx = jnp.einsum("bte,geh->tgbh", x, w_ih_g,
                    preferred_element_type=jnp.float32)                 # (T,4,B,Hp)
    gx = gx + bias_g[None, :, None, :]
    gx = jnp.pad(gx, ((0, 0), (0, 0), (0, Bp - B), (0, 0)))             # (T,4,Bp,Hp)

    # --- time chunking to amortize per-grid-step overhead --------------------
    Tc = min(T, time_chunk)
    while T % Tc:
        Tc -= 1
    n_chunks = T // Tc

    rec_bytes = (2 * Tc * 4 * Bp * Hp * 4      # gx blocks (double-buffered, f32)
                 + 2 * 4 * Hp * Hp * 2         # w_hh (bf16, double-buffered)
                 + 2 * Tc * Bp * Hp * 2        # h_seq blocks (bf16)
                 + 2 * Bp * Hp * 4)            # resident h_n / c_n (f32)
    rec_vmem = min(max(2 * rec_bytes, 32 * 1024 * 1024), 64 * 1024 * 1024)

    h_seq, h_n, c_n = pl.pallas_call(
        lstm_recurrence_kernel,
        out_shape=(
            jax.ShapeDtypeStruct((T, Bp, Hp), jnp.bfloat16),
            jax.ShapeDtypeStruct((Bp, Hp), jnp.float32),
            jax.ShapeDtypeStruct((Bp, Hp), jnp.float32),
        ),
        grid_spec=pltpu.PrefetchScalarGridSpec(
            num_scalar_prefetch=0,
            grid=(n_chunks,),
            in_specs=[
                pl.BlockSpec((Tc, 4, Bp, Hp), lambda t: (t, 0, 0, 0)),  # gates_x
                pl.BlockSpec((4, Hp, Hp), lambda t: (0, 0, 0)),         # w_hh
            ],
            out_specs=[
                pl.BlockSpec((Tc, Bp, Hp), lambda t: (t, 0, 0)),        # h per step
                pl.BlockSpec((Bp, Hp), lambda t: (0, 0)),               # h_n (resident)
                pl.BlockSpec((Bp, Hp), lambda t: (0, 0)),               # c_n (resident)
            ],
        ),
        compiler_params=pltpu.CompilerParams(
            dimension_semantics=("arbitrary",),
            vmem_limit_bytes=rec_vmem),
    )(gx, w_hh_g)

    # --- decoder: separate, fully parallel tiled matmul ----------------------
    M = T * Bp
    h_flat = h_seq.reshape(M, Hp)
    tm = 256
    while M % tm:
        tm //= 2
    tn = 512
    while Vp % tn:
        tn //= 2

    dec_bytes = 2 * (tm * Hp * 2 + Hp * tn * 2 + tn * 4 + tm * tn * 4)
    dec_vmem = min(max(2 * dec_bytes, 32 * 1024 * 1024), 64 * 1024 * 1024)

    logits_flat = pl.pallas_call(
        decoder_kernel,
        out_shape=jax.ShapeDtypeStruct((M, Vp), jnp.float32),
        grid_spec=pltpu.PrefetchScalarGridSpec(
            num_scalar_prefetch=0,
            grid=(M // tm, Vp // tn),
            in_specs=[
                pl.BlockSpec((tm, Hp), lambda i, j: (i, 0)),
                pl.BlockSpec((Hp, tn), lambda i, j: (0, j)),
                pl.BlockSpec((1, tn), lambda i, j: (0, j)),
            ],
            out_specs=pl.BlockSpec((tm, tn), lambda i, j: (i, j)),
        ),
        compiler_params=pltpu.CompilerParams(
            dimension_semantics=("parallel", "parallel"),
            vmem_limit_bytes=dec_vmem),
    )(h_flat, w_dec_p, b_dec_p)

    logits = logits_flat.reshape(T, Bp, Vp)[:, :B, :V]
    logits = jnp.transpose(logits, (1, 0, 2))                  # (B, T, V) batch_first
    h_n = h_n[:B, :H][None]                                    # (1, B, H)
    c_n = c_n[:B, :H][None]
    return logits, (h_n, c_n)


# --------------------------------------------------------------------------
# Pure-JAX f32 reference (lax.scan) mirroring torch.nn.LSTM semantics.
# --------------------------------------------------------------------------
def reference_forward(tokens, params):
    emb = params["embedding"]
    H = params["w_hh"].shape[1]
    w_ih_t = params["w_ih"].T
    w_hh_t = params["w_hh"].T
    b = params["b_ih"] + params["b_hh"]
    w_dec_t = params["w_dec"].T
    b_dec = params["b_dec"]
    x = emb[tokens]                      # (B, T, E)
    B = x.shape[0]

    def step(carry, x_t):
        h, c = carry
        gates = x_t @ w_ih_t + h @ w_hh_t + b
        i_g = jax.nn.sigmoid(gates[:, 0 * H:1 * H])
        f_g = jax.nn.sigmoid(gates[:, 1 * H:2 * H])
        g_g = jnp.tanh(gates[:, 2 * H:3 * H])
        o_g = jax.nn.sigmoid(gates[:, 3 * H:4 * H])
        c_new = f_g * c + i_g * g_g
        h_new = o_g * jnp.tanh(c_new)
        return (h_new, c_new), h_new

    h0 = jnp.zeros((B, H), jnp.float32)
    c0 = jnp.zeros((B, H), jnp.float32)
    (h_n, c_n), hs = jax.lax.scan(step, (h0, c0), jnp.transpose(x, (1, 0, 2)))
    hs = jnp.transpose(hs, (1, 0, 2))    # (B, T, H)
    logits = hs @ w_dec_t + b_dec
    return logits, (h_n[None], c_n[None])


def init_params(key, input_size, output_size, embedding_dim, hidden_size):
    """Deterministic synthetic init, shapes matching the PyTorch module."""
    ks = jax.random.split(key, 7)
    k = 1.0 / np.sqrt(hidden_size)
    emb = jax.random.normal(ks[0], (input_size, embedding_dim), jnp.float32)
    w_ih = jax.random.uniform(ks[1], (4 * hidden_size, embedding_dim),
                              jnp.float32, -k, k)
    w_hh = jax.random.uniform(ks[2], (4 * hidden_size, hidden_size),
                              jnp.float32, -k, k)
    b_ih = jax.random.uniform(ks[3], (4 * hidden_size,), jnp.float32, -k, k)
    b_hh = jax.random.uniform(ks[4], (4 * hidden_size,), jnp.float32, -k, k)
    w_dec = jax.random.uniform(ks[5], (output_size, hidden_size),
                               jnp.float32, -k, k)
    b_dec = jax.random.uniform(ks[6], (output_size,), jnp.float32, -k, k)
    return dict(embedding=emb, w_ih=w_ih, w_hh=w_hh, b_ih=b_ih, b_hh=b_hh,
                w_dec=w_dec, b_dec=b_dec)


if __name__ == "__main__":
    # small shapes implied by the module's forward
    B, T = 2, 8
    input_size = 32        # vocab
    output_size = 32
    embedding_dim = 32
    hidden_size = 32
    # TODO(synk): multi-layer LSTM (n_layers>1) with inter-layer dropout is not
    # implemented; the module here uses n_layers=1 where dropout is a no-op.

    key = jax.random.PRNGKey(0)
    k_tok, k_par = jax.random.split(key)
    tokens = jax.random.randint(k_tok, (B, T), 0, input_size, dtype=jnp.int32)
    params = init_params(k_par, input_size, output_size,
                         embedding_dim, hidden_size)

    fwd = jax.jit(text_generator_forward)
    logits, (h_n, c_n) = fwd(tokens, params)
    jax.block_until_ready((logits, h_n, c_n))

    ref_logits, (ref_h, ref_c) = reference_forward(tokens, params)
    # kernel runs bf16 weights / f32 accumulation -> loose-ish tolerance vs f32 ref
    np.testing.assert_allclose(np.asarray(logits), np.asarray(ref_logits),
                               atol=3e-2, rtol=3e-2)
    np.testing.assert_allclose(np.asarray(h_n), np.asarray(ref_h),
                               atol=3e-2, rtol=3e-2)
    np.testing.assert_allclose(np.asarray(c_n), np.asarray(ref_c),
                               atol=3e-2, rtol=3e-2)

    print("KERNEL_OK")
</pallas_src>

<mosaic_0001>
module attributes {stable_mosaic.version = 11 : i64} {
  func.func @lstm_recurrence_kernel(%arg0: i32, %arg1: memref<8x4x8x128xf32, #tpu.memory_space<vmem>>, %arg2: memref<4x128x128xbf16, #tpu.memory_space<vmem>>, %arg3: memref<8x8x128xbf16, #tpu.memory_space<vmem>>, %arg4: memref<8x128xf32, #tpu.memory_space<vmem>>, %arg5: memref<8x128xf32, #tpu.memory_space<vmem>>) attributes {dimension_semantics = [#tpu.dimension_semantics<arbitrary>], iteration_bounds = array<i64: 1>, scalar_prefetch = 0 : i64, scratch_operands = 0 : i64, tpu.core_type = #tpu.core_type<tc>, window_params = [{transform_indices = @transform_0, window_bounds = array<i64: 8, 4, 8, 128>}, {pipeline_mode = #tpu.pipeline_mode<synchronous>, transform_indices = @transform_1, window_bounds = array<i64: 4, 128, 128>}, {transform_indices = @transform_2, window_bounds = array<i64: 8, 8, 128>}, {pipeline_mode = #tpu.pipeline_mode<synchronous>, transform_indices = @transform_3, window_bounds = array<i64: 8, 128>}, {pipeline_mode = #tpu.pipeline_mode<synchronous>, transform_indices = @transform_4, window_bounds = array<i64: 8, 128>}]} {
    %c0_i32 = arith.constant 0 : i32
    %0 = arith.cmpi eq, %arg0, %c0_i32 : i32
    %1 = arith.extui %0 : i1 to i32
    %c0_i32_0 = arith.constant 0 : i32
    %2 = arith.cmpi ne, %1, %c0_i32_0 : i32
    scf.if %2 {
      %cst_113 = arith.constant 0.000000e+00 : f32
      %383 = vector.broadcast %cst_113 : f32 to vector<8x128xf32>
      %c0_114 = arith.constant 0 : index
      %c0_115 = arith.constant 0 : index
      %384 = vector.load %arg4[%c0_114, %c0_115] : memref<8x128xf32, #tpu.memory_space<vmem>>, vector<8x128xf32>
      tpu.vector_store %arg4[%c0_114, %c0_115], %383 {strides = array<i32>} : memref<8x128xf32, #tpu.memory_space<vmem>>, vector<8x128xf32>,
      %cst_116 = arith.constant 0.000000e+00 : f32
      %385 = vector.broadcast %cst_116 : f32 to vector<8x128xf32>
      %c0_117 = arith.constant 0 : index
      %c0_118 = arith.constant 0 : index
      %386 = vector.load %arg5[%c0_117, %c0_118] : memref<8x128xf32, #tpu.memory_space<vmem>>, vector<8x128xf32>
      tpu.vector_store %arg5[%c0_117, %c0_118], %385 {strides = array<i32>} : memref<8x128xf32, #tpu.memory_space<vmem>>, vector<8x128xf32>,
    } else {
    }
    %c0 = arith.constant 0 : index
    %c0_1 = arith.constant 0 : index
    %c0_2 = arith.constant 0 : index
    %3 = vector.load %arg2[%c0, %c0_1, %c0_2] : memref<4x128x128xbf16, #tpu.memory_space<vmem>>, vector<1x128x128xbf16>
    %4 = vector.shape_cast %3 : vector<1x128x128xbf16> to vector<128x128xbf16>
    %c1 = arith.constant 1 : index
    %c0_3 = arith.constant 0 : index
    %c0_4 = arith.constant 0 : index
    %5 = vector.load %arg2[%c1, %c0_3, %c0_4] : memref<4x128x128xbf16, #tpu.memory_space<vmem>>, vector<1x128x128xbf16>
    %6 = vector.shape_cast %5 : vector<1x128x128xbf16> to vector<128x128xbf16>
    %c2 = arith.constant 2 : index
    %c0_5 = arith.constant 0 : index
    %c0_6 = arith.constant 0 : index
    %7 = vector.load %arg2[%c2, %c0_5, %c0_6] : memref<4x128x128xbf16, #tpu.memory_space<vmem>>, vector<1x128x128xbf16>
    %8 = vector.shape_cast %7 : vector<1x128x128xbf16> to vector<128x128xbf16>
    %c3 = arith.constant 3 : index
    %c0_7 = arith.constant 0 : index
    %c0_8 = arith.constant 0 : index
    %9 = vector.load %arg2[%c3, %c0_7, %c0_8] : memref<4x128x128xbf16, #tpu.memory_space<vmem>>, vector<1x128x128xbf16>
    %10 = vector.shape_cast %9 : vector<1x128x128xbf16> to vector<128x128xbf16>
    %c0_9 = arith.constant 0 : index
    %c0_10 = arith.constant 0 : index
    %11 = vector.load %arg4[%c0_9, %c0_10] : memref<8x128xf32, #tpu.memory_space<vmem>>, vector<8x128xf32>
    %c0_11 = arith.constant 0 : index
    %c0_12 = arith.constant 0 : index
    %12 = vector.load %arg5[%c0_11, %c0_12] : memref<8x128xf32, #tpu.memory_space<vmem>>, vector<8x128xf32>
    %c0_i32_13 = arith.constant 0 : i32
    %13 = arith.index_cast %c0_i32_13 : i32 to index
    %c0_14 = arith.constant 0 : index
    %c0_15 = arith.constant 0 : index
    %c0_16 = arith.constant 0 : index
    %14 = vector.load %arg1[%13, %c0_14, %c0_15, %c0_16] : memref<8x4x8x128xf32, #tpu.memory_space<vmem>>, vector<1x4x8x128xf32>
    %15 = vector.shape_cast %14 : vector<1x4x8x128xf32> to vector<4x8x128xf32>
    %16 = arith.truncf %11 : vector<8x128xf32> to vector<8x128xbf16>
    %17 = vector.extract_strided_slice %15 {offsets = [0, 0, 0], sizes = [1, 8, 128], strides = [1, 1, 1]} : vector<4x8x128xf32> to vector<1x8x128xf32>
    %18 = vector.shape_cast %17 : vector<1x8x128xf32> to vector<8x128xf32>
    %cst = arith.constant dense<0.000000e+00> : vector<8x128xf32>
    %19 = tpu.matmul %16, %4, %cst {dimension_numbers = #tpu.dot_dimension_numbers<[1], [0], [0], [1], [0, 0, 1, 1], [], []>} : vector<8x128xbf16>, vector<128x128xbf16>, vector<8x128xf32> -> vector<8x128xf32>
    %20 = arith.addf %18, %19 : vector<8x128xf32>
    %21 = vector.extract_strided_slice %15 {offsets = [1, 0, 0], sizes = [1, 8, 128], strides = [1, 1, 1]} : vector<4x8x128xf32> to vector<1x8x128xf32>
    %22 = vector.shape_cast %21 : vector<1x8x128xf32> to vector<8x128xf32>
    %cst_17 = arith.constant dense<0.000000e+00> : vector<8x128xf32>
    %23 = tpu.matmul %16, %6, %cst_17 {dimension_numbers = #tpu.dot_dimension_numbers<[1], [0], [0], [1], [0, 0, 1, 1], [], []>} : vector<8x128xbf16>, vector<128x128xbf16>, vector<8x128xf32> -> vector<8x128xf32>
    %24 = arith.addf %22, %23 : vector<8x128xf32>
    %25 = vector.extract_strided_slice %15 {offsets = [2, 0, 0], sizes = [1, 8, 128], strides = [1, 1, 1]} : vector<4x8x128xf32> to vector<1x8x128xf32>
    %26 = vector.shape_cast %25 : vector<1x8x128xf32> to vector<8x128xf32>
    %cst_18 = arith.constant dense<0.000000e+00> : vector<8x128xf32>
    %27 = tpu.matmul %16, %8, %cst_18 {dimension_numbers = #tpu.dot_dimension_numbers<[1], [0], [0], [1], [0, 0, 1, 1], [], []>} : vector<8x128xbf16>, vector<128x128xbf16>, vector<8x128xf32> -> vector<8x128xf32>
    %28 = arith.addf %26, %27 : vector<8x128xf32>
    %29 = vector.extract_strided_slice %15 {offsets = [3, 0, 0], sizes = [1, 8, 128], strides = [1, 1, 1]} : vector<4x8x128xf32> to vector<1x8x128xf32>
    %30 = vector.shape_cast %29 : vector<1x8x128xf32> to vector<8x128xf32>
    %cst_19 = arith.constant dense<0.000000e+00> : vector<8x128xf32>
    %31 = tpu.matmul %16, %10, %cst_19 {dimension_numbers = #tpu.dot_dimension_numbers<[1], [0], [0], [1], [0, 0, 1, 1], [], []>} : vector<8x128xbf16>, vector<128x128xbf16>, vector<8x128xf32> -> vector<8x128xf32>
    %32 = arith.addf %30, %31 : vector<8x128xf32>
    %33 = arith.negf %20 : vector<8x128xf32>
    %34 = math.exp %33 : vector<8x128xf32>
    %cst_20 = arith.constant 1.000000e+00 : f32
    %35 = vector.broadcast %cst_20 : f32 to vector<8x128xf32>
    %36 = arith.addf %35, %34 : vector<8x128xf32>
    %37 = arith.divf %35, %36 : vector<8x128xf32>
    %38 = arith.negf %24 : vector<8x128xf32>
    %39 = math.exp %38 : vector<8x128xf32>
    %cst_21 = arith.constant 1.000000e+00 : f32
    %40 = vector.broadcast %cst_21 : f32 to vector<8x128xf32>
    %41 = arith.addf %40, %39 : vector<8x128xf32>
    %42 = arith.divf %40, %41 : vector<8x128xf32>
    %43 = math.tanh %28 : vector<8x128xf32>
    %44 = arith.negf %32 : vector<8x128xf32>
    %45 = math.exp %44 : vector<8x128xf32>
    %cst_22 = arith.constant 1.000000e+00 : f32
    %46 = vector.broadcast %cst_22 : f32 to vector<8x128xf32>
    %47 = arith.addf %46, %45 : vector<8x128xf32>
    %48 = arith.divf %46, %47 : vector<8x128xf32>
    %49 = arith.mulf %42, %12 : vector<8x128xf32>
    %50 = arith.mulf %37, %43 : vector<8x128xf32>
    %51 = arith.addf %49, %50 : vector<8x128xf32>
    %52 = math.tanh %51 : vector<8x128xf32>
    %53 = arith.mulf %48, %52 : vector<8x128xf32>
    %54 = arith.truncf %53 : vector<8x128xf32> to vector<8x128xbf16>
    %55 = arith.index_cast %c0_i32_13 : i32 to index
    %c0_23 = arith.constant 0 : index
    %c0_24 = arith.constant 0 : index
    %56 = vector.load %arg3[%55, %c0_23, %c0_24] : memref<8x8x128xbf16, #tpu.memory_space<vmem>>, vector<1x8x128xbf16>
    %57 = vector.shape_cast %56 : vector<1x8x128xbf16> to vector<8x128xbf16>
    %58 = vector.shape_cast %54 : vector<8x128xbf16> to vector<1x8x128xbf16>
    tpu.vector_store %arg3[%55, %c0_23, %c0_24], %58 {strides = array<i32>} : memref<8x8x128xbf16, #tpu.memory_space<vmem>>, vector<1x8x128xbf16>,
    %c1_i32 = arith.constant 1 : i32
    %59 = arith.index_cast %c1_i32 : i32 to index
    %c0_25 = arith.constant 0 : index
    %c0_26 = arith.constant 0 : index
    %c0_27 = arith.constant 0 : index
    %60 = vector.load %arg1[%59, %c0_25, %c0_26, %c0_27] : memref<8x4x8x128xf32, #tpu.memory_space<vmem>>, vector<1x4x8x128xf32>
    %61 = vector.shape_cast %60 : vector<1x4x8x128xf32> to vector<4x8x128xf32>
    %62 = arith.truncf %53 : vector<8x128xf32> to vector<8x128xbf16>
    %63 = vector.extract_strided_slice %61 {offsets = [0, 0, 0], sizes = [1, 8, 128], strides = [1, 1, 1]} : vector<4x8x128xf32> to vector<1x8x128xf32>
    %64 = vector.shape_cast %63 : vector<1x8x128xf32> to vector<8x128xf32>
    %cst_28 = arith.constant dense<0.000000e+00> : vector<8x128xf32>
    %65 = tpu.matmul %62, %4, %cst_28 {dimension_numbers = #tpu.dot_dimension_numbers<[1], [0], [0], [1], [0, 0, 1, 1], [], []>} : vector<8x128xbf16>, vector<128x128xbf16>, vector<8x128xf32> -> vector<8x128xf32>
    %66 = arith.addf %64, %65 : vector<8x128xf32>
    %67 = vector.extract_strided_slice %61 {offsets = [1, 0, 0], sizes = [1, 8, 128], strides = [1, 1, 1]} : vector<4x8x128xf32> to vector<1x8x128xf32>
    %68 = vector.shape_cast %67 : vector<1x8x128xf32> to vector<8x128xf32>
    %cst_29 = arith.constant dense<0.000000e+00> : vector<8x128xf32>
    %69 = tpu.matmul %62, %6, %cst_29 {dimension_numbers = #tpu.dot_dimension_numbers<[1], [0], [0], [1], [0, 0, 1, 1], [], []>} : vector<8x128xbf16>, vector<128x128xbf16>, vector<8x128xf32> -> vector<8x128xf32>
    %70 = arith.addf %68, %69 : vector<8x128xf32>
    %71 = vector.extract_strided_slice %61 {offsets = [2, 0, 0], sizes = [1, 8, 128], strides = [1, 1, 1]} : vector<4x8x128xf32> to vector<1x8x128xf32>
    %72 = vector.shape_cast %71 : vector<1x8x128xf32> to vector<8x128xf32>
    %cst_30 = arith.constant dense<0.000000e+00> : vector<8x128xf32>
    %73 = tpu.matmul %62, %8, %cst_30 {dimension_numbers = #tpu.dot_dimension_numbers<[1], [0], [0], [1], [0, 0, 1, 1], [], []>} : vector<8x128xbf16>, vector<128x128xbf16>, vector<8x128xf32> -> vector<8x128xf32>
    %74 = arith.addf %72, %73 : vector<8x128xf32>
    %75 = vector.extract_strided_slice %61 {offsets = [3, 0, 0], sizes = [1, 8, 128], strides = [1, 1, 1]} : vector<4x8x128xf32> to vector<1x8x128xf32>
    %76 = vector.shape_cast %75 : vector<1x8x128xf32> to vector<8x128xf32>
    %cst_31 = arith.constant dense<0.000000e+00> : vector<8x128xf32>
    %77 = tpu.matmul %62, %10, %cst_31 {dimension_numbers = #tpu.dot_dimension_numbers<[1], [0], [0], [1], [0, 0, 1, 1], [], []>} : vector<8x128xbf16>, vector<128x128xbf16>, vector<8x128xf32> -> vector<8x128xf32>
    %78 = arith.addf %76, %77 : vector<8x128xf32>
    %79 = arith.negf %66 : vector<8x128xf32>
    %80 = math.exp %79 : vector<8x128xf32>
    %cst_32 = arith.constant 1.000000e+00 : f32
    %81 = vector.broadcast %cst_32 : f32 to vector<8x128xf32>
    %82 = arith.addf %81, %80 : vector<8x128xf32>
    %83 = arith.divf %81, %82 : vector<8x128xf32>
    %84 = arith.negf %70 : vector<8x128xf32>
    %85 = math.exp %84 : vector<8x128xf32>
    %cst_33 = arith.constant 1.000000e+00 : f32
    %86 = vector.broadcast %cst_33 : f32 to vector<8x128xf32>
    %87 = arith.addf %86, %85 : vector<8x128xf32>
    %88 = arith.divf %86, %87 : vector<8x128xf32>
    %89 = math.tanh %74 : vector<8x128xf32>
    %90 = arith.negf %78 : vector<8x128xf32>
    %91 = math.exp %90 : vector<8x128xf32>
    %cst_34 = arith.constant 1.000000e+00 : f32
    %92 = vector.broadcast %cst_34 : f32 to vector<8x128xf32>
    %93 = arith.addf %92, %91 : vector<8x128xf32>
    %94 = arith.divf %92, %93 : vector<8x128xf32>
    %95 = arith.mulf %88, %51 : vector<8x128xf32>
    %96 = arith.mulf %83, %89 : vector<8x128xf32>
    %97 = arith.addf %95, %96 : vector<8x128xf32>
    %98 = math.tanh %97 : vector<8x128xf32>
    %99 = arith.mulf %94, %98 : vector<8x128xf32>
    %100 = arith.truncf %99 : vector<8x128xf32> to vector<8x128xbf16>
    %101 = arith.index_cast %c1_i32 : i32 to index
    %c0_35 = arith.constant 0 : index
    %c0_36 = arith.constant 0 : index
    %102 = vector.load %arg3[%101, %c0_35, %c0_36] : memref<8x8x128xbf16, #tpu.memory_space<vmem>>, vector<1x8x128xbf16>
    %103 = vector.shape_cast %102 : vector<1x8x128xbf16> to vector<8x128xbf16>
    %104 = vector.shape_cast %100 : vector<8x128xbf16> to vector<1x8x128xbf16>
    tpu.vector_store %arg3[%101, %c0_35, %c0_36], %104 {strides = array<i32>} : memref<8x8x128xbf16, #tpu.memory_space<vmem>>, vector<1x8x128xbf16>,
    %c2_i32 = arith.constant 2 : i32
    %105 = arith.index_cast %c2_i32 : i32 to index
    %c0_37 = arith.constant 0 : index
    %c0_38 = arith.constant 0 : index
    %c0_39 = arith.constant 0 : index
    %106 = vector.load %arg1[%105, %c0_37, %c0_38, %c0_39] : memref<8x4x8x128xf32, #tpu.memory_space<vmem>>, vector<1x4x8x128xf32>
    %107 = vector.shape_cast %106 : vector<1x4x8x128xf32> to vector<4x8x128xf32>
    %108 = arith.truncf %99 : vector<8x128xf32> to vector<8x128xbf16>
    %109 = vector.extract_strided_slice %107 {offsets = [0, 0, 0], sizes = [1, 8, 128], strides = [1, 1, 1]} : vector<4x8x128xf32> to vector<1x8x128xf32>
    %110 = vector.shape_cast %109 : vector<1x8x128xf32> to vector<8x128xf32>
    %cst_40 = arith.constant dense<0.000000e+00> : vector<8x128xf32>
    %111 = tpu.matmul %108, %4, %cst_40 {dimension_numbers = #tpu.dot_dimension_numbers<[1], [0], [0], [1], [0, 0, 1, 1], [], []>} : vector<8x128xbf16>, vector<128x128xbf16>, vector<8x128xf32> -> vector<8x128xf32>
    %112 = arith.addf %110, %111 : vector<8x128xf32>
    %113 = vector.extract_strided_slice %107 {offsets = [1, 0, 0], sizes = [1, 8, 128], strides = [1, 1, 1]} : vector<4x8x128xf32> to vector<1x8x128xf32>
    %114 = vector.shape_cast %113 : vector<1x8x128xf32> to vector<8x128xf32>
    %cst_41 = arith.constant dense<0.000000e+00> : vector<8x128xf32>
    %115 = tpu.matmul %108, %6, %cst_41 {dimension_numbers = #tpu.dot_dimension_numbers<[1], [0], [0], [1], [0, 0, 1, 1], [], []>} : vector<8x128xbf16>, vector<128x128xbf16>, vector<8x128xf32> -> vector<8x128xf32>
    %116 = arith.addf %114, %115 : vector<8x128xf32>
    %117 = vector.extract_strided_slice %107 {offsets = [2, 0, 0], sizes = [1, 8, 128], strides = [1, 1, 1]} : vector<4x8x128xf32> to vector<1x8x128xf32>
    %118 = vector.shape_cast %117 : vector<1x8x128xf32> to vector<8x128xf32>
    %cst_42 = arith.constant dense<0.000000e+00> : vector<8x128xf32>
    %119 = tpu.matmul %108, %8, %cst_42 {dimension_numbers = #tpu.dot_dimension_numbers<[1], [0], [0], [1], [0, 0, 1, 1], [], []>} : vector<8x128xbf16>, vector<128x128xbf16>, vector<8x128xf32> -> vector<8x128xf32>
    %120 = arith.addf %118, %119 : vector<8x128xf32>
    %121 = vector.extract_strided_slice %107 {offsets = [3, 0, 0], sizes = [1, 8, 128], strides = [1, 1, 1]} : vector<4x8x128xf32> to vector<1x8x128xf32>
    %122 = vector.shape_cast %121 : vector<1x8x128xf32> to vector<8x128xf32>
    %cst_43 = arith.constant dense<0.000000e+00> : vector<8x128xf32>
    %123 = tpu.matmul %108, %10, %cst_43 {dimension_numbers = #tpu.dot_dimension_numbers<[1], [0], [0], [1], [0, 0, 1, 1], [], []>} : vector<8x128xbf16>, vector<128x128xbf16>, vector<8x128xf32> -> vector<8x128xf32>
    %124 = arith.addf %122, %123 : vector<8x128xf32>
    %125 = arith.negf %112 : vector<8x128xf32>
    %126 = math.exp %125 : vector<8x128xf32>
    %cst_44 = arith.constant 1.000000e+00 : f32
    %127 = vector.broadcast %cst_44 : f32 to vector<8x128xf32>
    %128 = arith.addf %127, %126 : vector<8x128xf32>
    %129 = arith.divf %127, %128 : vector<8x128xf32>
    %130 = arith.negf %116 : vector<8x128xf32>
    %131 = math.exp %130 : vector<8x128xf32>
    %cst_45 = arith.constant 1.000000e+00 : f32
    %132 = vector.broadcast %cst_45 : f32 to vector<8x128xf32>
    %133 = arith.addf %132, %131 : vector<8x128xf32>
    %134 = arith.divf %132, %133 : vector<8x128xf32>
    %135 = math.tanh %120 : vector<8x128xf32>
    %136 = arith.negf %124 : vector<8x128xf32>
    %137 = math.exp %136 : vector<8x128xf32>
    %cst_46 = arith.constant 1.000000e+00 : f32
    %138 = vector.broadcast %cst_46 : f32 to vector<8x128xf32>
    %139 = arith.addf %138, %137 : vector<8x128xf32>
    %140 = arith.divf %138, %139 : vector<8x128xf32>
    %141 = arith.mulf %134, %97 : vector<8x128xf32>
    %142 = arith.mulf %129, %135 : vector<8x128xf32>
    %143 = arith.addf %141, %142 : vector<8x128xf32>
    %144 = math.tanh %143 : vector<8x128xf32>
    %145 = arith.mulf %140, %144 : vector<8x128xf32>
    %146 = arith.truncf %145 : vector<8x128xf32> to vector<8x128xbf16>
    %147 = arith.index_cast %c2_i32 : i32 to index
    %c0_47 = arith.constant 0 : index
    %c0_48 = arith.constant 0 : index
    %148 = vector.load %arg3[%147, %c0_47, %c0_48] : memref<8x8x128xbf16, #tpu.memory_space<vmem>>, vector<1x8x128xbf16>
    %149 = vector.shape_cast %148 : vector<1x8x128xbf16> to vector<8x128xbf16>
    %150 = vector.shape_cast %146 : vector<8x128xbf16> to vector<1x8x128xbf16>
    tpu.vector_store %arg3[%147, %c0_47, %c0_48], %150 {strides = array<i32>} : memref<8x8x128xbf16, #tpu.memory_space<vmem>>, vector<1x8x128xbf16>,
    %c3_i32 = arith.constant 3 : i32
    %151 = arith.index_cast %c3_i32 : i32 to index
    %c0_49 = arith.constant 0 : index
    %c0_50 = arith.constant 0 : index
    %c0_51 = arith.constant 0 : index
    %152 = vector.load %arg1[%151, %c0_49, %c0_50, %c0_51] : memref<8x4x8x128xf32, #tpu.memory_space<vmem>>, vector<1x4x8x128xf32>
    %153 = vector.shape_cast %152 : vector<1x4x8x128xf32> to vector<4x8x128xf32>
    %154 = arith.truncf %145 : vector<8x128xf32> to vector<8x128xbf16>
    %155 = vector.extract_strided_slice %153 {offsets = [0, 0, 0], sizes = [1, 8, 128], strides = [1, 1, 1]} : vector<4x8x128xf32> to vector<1x8x128xf32>
    %156 = vector.shape_cast %155 : vector<1x8x128xf32> to vector<8x128xf32>
    %cst_52 = arith.constant dense<0.000000e+00> : vector<8x128xf32>
    %157 = tpu.matmul %154, %4, %cst_52 {dimension_numbers = #tpu.dot_dimension_numbers<[1], [0], [0], [1], [0, 0, 1, 1], [], []>} : vector<8x128xbf16>, vector<128x128xbf16>, vector<8x128xf32> -> vector<8x128xf32>
    %158 = arith.addf %156, %157 : vector<8x128xf32>
    %159 = vector.extract_strided_slice %153 {offsets = [1, 0, 0], sizes = [1, 8, 128], strides = [1, 1, 1]} : vector<4x8x128xf32> to vector<1x8x128xf32>
    %160 = vector.shape_cast %159 : vector<1x8x128xf32> to vector<8x128xf32>
    %cst_53 = arith.constant dense<0.000000e+00> : vector<8x128xf32>
    %161 = tpu.matmul %154, %6, %cst_53 {dimension_numbers = #tpu.dot_dimension_numbers<[1], [0], [0], [1], [0, 0, 1, 1], [], []>} : vector<8x128xbf16>, vector<128x128xbf16>, vector<8x128xf32> -> vector<8x128xf32>
    %162 = arith.addf %160, %161 : vector<8x128xf32>
    %163 = vector.extract_strided_slice %153 {offsets = [2, 0, 0], sizes = [1, 8, 128], strides = [1, 1, 1]} : vector<4x8x128xf32> to vector<1x8x128xf32>
    %164 = vector.shape_cast %163 : vector<1x8x128xf32> to vector<8x128xf32>
    %cst_54 = arith.constant dense<0.000000e+00> : vector<8x128xf32>
    %165 = tpu.matmul %154, %8, %cst_54 {dimension_numbers = #tpu.dot_dimension_numbers<[1], [0], [0], [1], [0, 0, 1, 1], [], []>} : vector<8x128xbf16>, vector<128x128xbf16>, vector<8x128xf32> -> vector<8x128xf32>
    %166 = arith.addf %164, %165 : vector<8x128xf32>
    %167 = vector.extract_strided_slice %153 {offsets = [3, 0, 0], sizes = [1, 8, 128], strides = [1, 1, 1]} : vector<4x8x128xf32> to vector<1x8x128xf32>
    %168 = vector.shape_cast %167 : vector<1x8x128xf32> to vector<8x128xf32>
    %cst_55 = arith.constant dense<0.000000e+00> : vector<8x128xf32>
    %169 = tpu.matmul %154, %10, %cst_55 {dimension_numbers = #tpu.dot_dimension_numbers<[1], [0], [0], [1], [0, 0, 1, 1], [], []>} : vector<8x128xbf16>, vector<128x128xbf16>, vector<8x128xf32> -> vector<8x128xf32>
    %170 = arith.addf %168, %169 : vector<8x128xf32>
    %171 = arith.negf %158 : vector<8x128xf32>
    %172 = math.exp %171 : vector<8x128xf32>
    %cst_56 = arith.constant 1.000000e+00 : f32
    %173 = vector.broadcast %cst_56 : f32 to vector<8x128xf32>
    %174 = arith.addf %173, %172 : vector<8x128xf32>
    %175 = arith.divf %173, %174 : vector<8x128xf32>
    %176 = arith.negf %162 : vector<8x128xf32>
    %177 = math.exp %176 : vector<8x128xf32>
    %cst_57 = arith.constant 1.000000e+00 : f32
    %178 = vector.broadcast %cst_57 : f32 to vector<8x128xf32>
    %179 = arith.addf %178, %177 : vector<8x128xf32>
    %180 = arith.divf %178, %179 : vector<8x128xf32>
    %181 = math.tanh %166 : vector<8x128xf32>
    %182 = arith.negf %170 : vector<8x128xf32>
    %183 = math.exp %182 : vector<8x128xf32>
    %cst_58 = arith.constant 1.000000e+00 : f32
    %184 = vector.broadcast %cst_58 : f32 to vector<8x128xf32>
    %185 = arith.addf %184, %183 : vector<8x128xf32>
    %186 = arith.divf %184, %185 : vector<8x128xf32>
    %187 = arith.mulf %180, %143 : vector<8x128xf32>
    %188 = arith.mulf %175, %181 : vector<8x128xf32>
    %189 = arith.addf %187, %188 : vector<8x128xf32>
    %190 = math.tanh %189 : vector<8x128xf32>
    %191 = arith.mulf %186, %190 : vector<8x128xf32>
    %192 = arith.truncf %191 : vector<8x128xf32> to vector<8x128xbf16>
    %193 = arith.index_cast %c3_i32 : i32 to index
    %c0_59 = arith.constant 0 : index
    %c0_60 = arith.constant 0 : index
    %194 = vector.load %arg3[%193, %c0_59, %c0_60] : memref<8x8x128xbf16, #tpu.memory_space<vmem>>, vector<1x8x128xbf16>
    %195 = vector.shape_cast %194 : vector<1x8x128xbf16> to vector<8x128xbf16>
    %196 = vector.shape_cast %192 : vector<8x128xbf16> to vector<1x8x128xbf16>
    tpu.vector_store %arg3[%193, %c0_59, %c0_60], %196 {strides = array<i32>} : memref<8x8x128xbf16, #tpu.memory_space<vmem>>, vector<1x8x128xbf16>,
    %c4_i32 = arith.constant 4 : i32
    %197 = arith.index_cast %c4_i32 : i32 to index
    %c0_61 = arith.constant 0 : index
    %c0_62 = arith.constant 0 : index
    %c0_63 = arith.constant 0 : index
    %198 = vector.load %arg1[%197, %c0_61, %c0_62, %c0_63] : memref<8x4x8x128xf32, #tpu.memory_space<vmem>>, vector<1x4x8x128xf32>
    %199 = vector.shape_cast %198 : vector<1x4x8x128xf32> to vector<4x8x128xf32>
    %200 = arith.truncf %191 : vector<8x128xf32> to vector<8x128xbf16>
    %201 = vector.extract_strided_slice %199 {offsets = [0, 0, 0], sizes = [1, 8, 128], strides = [1, 1, 1]} : vector<4x8x128xf32> to vector<1x8x128xf32>
    %202 = vector.shape_cast %201 : vector<1x8x128xf32> to vector<8x128xf32>
    %cst_64 = arith.constant dense<0.000000e+00> : vector<8x128xf32>
    %203 = tpu.matmul %200, %4, %cst_64 {dimension_numbers = #tpu.dot_dimension_numbers<[1], [0], [0], [1], [0, 0, 1, 1], [], []>} : vector<8x128xbf16>, vector<128x128xbf16>, vector<8x128xf32> -> vector<8x128xf32>
    %204 = arith.addf %202, %203 : vector<8x128xf32>
    %205 = vector.extract_strided_slice %199 {offsets = [1, 0, 0], sizes = [1, 8, 128], strides = [1, 1, 1]} : vector<4x8x128xf32> to vector<1x8x128xf32>
    %206 = vector.shape_cast %205 : vector<1x8x128xf32> to vector<8x128xf32>
    %cst_65 = arith.constant dense<0.000000e+00> : vector<8x128xf32>
    %207 = tpu.matmul %200, %6, %cst_65 {dimension_numbers = #tpu.dot_dimension_numbers<[1], [0], [0], [1], [0, 0, 1, 1], [], []>} : vector<8x128xbf16>, vector<128x128xbf16>, vector<8x128xf32> -> vector<8x128xf32>
    %208 = arith.addf %206, %207 : vector<8x128xf32>
    %209 = vector.extract_strided_slice %199 {offsets = [2, 0, 0], sizes = [1, 8, 128], strides = [1, 1, 1]} : vector<4x8x128xf32> to vector<1x8x128xf32>
    %210 = vector.shape_cast %209 : vector<1x8x128xf32> to vector<8x128xf32>
    %cst_66 = arith.constant dense<0.000000e+00> : vector<8x128xf32>
    %211 = tpu.matmul %200, %8, %cst_66 {dimension_numbers = #tpu.dot_dimension_numbers<[1], [0], [0], [1], [0, 0, 1, 1], [], []>} : vector<8x128xbf16>, vector<128x128xbf16>, vector<8x128xf32> -> vector<8x128xf32>
    %212 = arith.addf %210, %211 : vector<8x128xf32>
    %213 = vector.extract_strided_slice %199 {offsets = [3, 0, 0], sizes = [1, 8, 128], strides = [1, 1, 1]} : vector<4x8x128xf32> to vector<1x8x128xf32>
    %214 = vector.shape_cast %213 : vector<1x8x128xf32> to vector<8x128xf32>
    %cst_67 = arith.constant dense<0.000000e+00> : vector<8x128xf32>
    %215 = tpu.matmul %200, %10, %cst_67 {dimension_numbers = #tpu.dot_dimension_numbers<[1], [0], [0], [1], [0, 0, 1, 1], [], []>} : vector<8x128xbf16>, vector<128x128xbf16>, vector<8x128xf32> -> vector<8x128xf32>
    %216 = arith.addf %214, %215 : vector<8x128xf32>
    %217 = arith.negf %204 : vector<8x128xf32>
    %218 = math.exp %217 : vector<8x128xf32>
    %cst_68 = arith.constant 1.000000e+00 : f32
    %219 = vector.broadcast %cst_68 : f32 to vector<8x128xf32>
    %220 = arith.addf %219, %218 : vector<8x128xf32>
    %221 = arith.divf %219, %220 : vector<8x128xf32>
    %222 = arith.negf %208 : vector<8x128xf32>
    %223 = math.exp %222 : vector<8x128xf32>
    %cst_69 = arith.constant 1.000000e+00 : f32
    %224 = vector.broadcast %cst_69 : f32 to vector<8x128xf32>
    %225 = arith.addf %224, %223 : vector<8x128xf32>
    %226 = arith.divf %224, %225 : vector<8x128xf32>
    %227 = math.tanh %212 : vector<8x128xf32>
    %228 = arith.negf %216 : vector<8x128xf32>
    %229 = math.exp %228 : vector<8x128xf32>
    %cst_70 = arith.constant 1.000000e+00 : f32
    %230 = vector.broadcast %cst_70 : f32 to vector<8x128xf32>
    %231 = arith.addf %230, %229 : vector<8x128xf32>
    %232 = arith.divf %230, %231 : vector<8x128xf32>
    %233 = arith.mulf %226, %189 : vector<8x128xf32>
    %234 = arith.mulf %221, %227 : vector<8x128xf32>
    %235 = arith.addf %233, %234 : vector<8x128xf32>
    %236 = math.tanh %235 : vector<8x128xf32>
    %237 = arith.mulf %232, %236 : vector<8x128xf32>
    %238 = arith.truncf %237 : vector<8x128xf32> to vector<8x128xbf16>
    %239 = arith.index_cast %c4_i32 : i32 to index
    %c0_71 = arith.constant 0 : index
    %c0_72 = arith.constant 0 : index
    %240 = vector.load %arg3[%239, %c0_71, %c0_72] : memref<8x8x128xbf16, #tpu.memory_space<vmem>>, vector<1x8x128xbf16>
    %241 = vector.shape_cast %240 : vector<1x8x128xbf16> to vector<8x128xbf16>
    %242 = vector.shape_cast %238 : vector<8x128xbf16> to vector<1x8x128xbf16>
    tpu.vector_store %arg3[%239, %c0_71, %c0_72], %242 {strides = array<i32>} : memref<8x8x128xbf16, #tpu.memory_space<vmem>>, vector<1x8x128xbf16>,
    %c5_i32 = arith.constant 5 : i32
    %243 = arith.index_cast %c5_i32 : i32 to index
    %c0_73 = arith.constant 0 : index
    %c0_74 = arith.constant 0 : index
    %c0_75 = arith.constant 0 : index
    %244 = vector.load %arg1[%243, %c0_73, %c0_74, %c0_75] : memref<8x4x8x128xf32, #tpu.memory_space<vmem>>, vector<1x4x8x128xf32>
    %245 = vector.shape_cast %244 : vector<1x4x8x128xf32> to vector<4x8x128xf32>
    %246 = arith.truncf %237 : vector<8x128xf32> to vector<8x128xbf16>
    %247 = vector.extract_strided_slice %245 {offsets = [0, 0, 0], sizes = [1, 8, 128], strides = [1, 1, 1]} : vector<4x8x128xf32> to vector<1x8x128xf32>
    %248 = vector.shape_cast %247 : vector<1x8x128xf32> to vector<8x128xf32>
    %cst_76 = arith.constant dense<0.000000e+00> : vector<8x128xf32>
    %249 = tpu.matmul %246, %4, %cst_76 {dimension_numbers = #tpu.dot_dimension_numbers<[1], [0], [0], [1], [0, 0, 1, 1], [], []>} : vector<8x128xbf16>, vector<128x128xbf16>, vector<8x128xf32> -> vector<8x128xf32>
    %250 = arith.addf %248, %249 : vector<8x128xf32>
    %251 = vector.extract_strided_slice %245 {offsets = [1, 0, 0], sizes = [1, 8, 128], strides = [1, 1, 1]} : vector<4x8x128xf32> to vector<1x8x128xf32>
    %252 = vector.shape_cast %251 : vector<1x8x128xf32> to vector<8x128xf32>
    %cst_77 = arith.constant dense<0.000000e+00> : vector<8x128xf32>
    %253 = tpu.matmul %246, %6, %cst_77 {dimension_numbers = #tpu.dot_dimension_numbers<[1], [0], [0], [1], [0, 0, 1, 1], [], []>} : vector<8x128xbf16>, vector<128x128xbf16>, vector<8x128xf32> -> vector<8x128xf32>
    %254 = arith.addf %252, %253 : vector<8x128xf32>
    %255 = vector.extract_strided_slice %245 {offsets = [2, 0, 0], sizes = [1, 8, 128], strides = [1, 1, 1]} : vector<4x8x128xf32> to vector<1x8x128xf32>
    %256 = vector.shape_cast %255 : vector<1x8x128xf32> to vector<8x128xf32>
    %cst_78 = arith.constant dense<0.000000e+00> : vector<8x128xf32>
    %257 = tpu.matmul %246, %8, %cst_78 {dimension_numbers = #tpu.dot_dimension_numbers<[1], [0], [0], [1], [0, 0, 1, 1], [], []>} : vector<8x128xbf16>, vector<128x128xbf16>, vector<8x128xf32> -> vector<8x128xf32>
    %258 = arith.addf %256, %257 : vector<8x128xf32>
    %259 = vector.extract_strided_slice %245 {offsets = [3, 0, 0], sizes = [1, 8, 128], strides = [1, 1, 1]} : vector<4x8x128xf32> to vector<1x8x128xf32>
    %260 = vector.shape_cast %259 : vector<1x8x128xf32> to vector<8x128xf32>
    %cst_79 = arith.constant dense<0.000000e+00> : vector<8x128xf32>
    %261 = tpu.matmul %246, %10, %cst_79 {dimension_numbers = #tpu.dot_dimension_numbers<[1], [0], [0], [1], [0, 0, 1, 1], [], []>} : vector<8x128xbf16>, vector<128x128xbf16>, vector<8x128xf32> -> vector<8x128xf32>
    %262 = arith.addf %260, %261 : vector<8x128xf32>
    %263 = arith.negf %250 : vector<8x128xf32>
    %264 = math.exp %263 : vector<8x128xf32>
    %cst_80 = arith.constant 1.000000e+00 : f32
    %265 = vector.broadcast %cst_80 : f32 to vector<8x128xf32>
    %266 = arith.addf %265, %264 : vector<8x128xf32>
    %267 = arith.divf %265, %266 : vector<8x128xf32>
    %268 = arith.negf %254 : vector<8x128xf32>
    %269 = math.exp %268 : vector<8x128xf32>
    %cst_81 = arith.constant 1.000000e+00 : f32
    %270 = vector.broadcast %cst_81 : f32 to vector<8x128xf32>
    %271 = arith.addf %270, %269 : vector<8x128xf32>
    %272 = arith.divf %270, %271 : vector<8x128xf32>
    %273 = math.tanh %258 : vector<8x128xf32>
    %274 = arith.negf %262 : vector<8x128xf32>
    %275 = math.exp %274 : vector<8x128xf32>
    %cst_82 = arith.constant 1.000000e+00 : f32
    %276 = vector.broadcast %cst_82 : f32 to vector<8x128xf32>
    %277 = arith.addf %276, %275 : vector<8x128xf32>
    %278 = arith.divf %276, %277 : vector<8x128xf32>
    %279 = arith.mulf %272, %235 : vector<8x128xf32>
    %280 = arith.mulf %267, %273 : vector<8x128xf32>
    %281 = arith.addf %279, %280 : vector<8x128xf32>
    %282 = math.tanh %281 : vector<8x128xf32>
    %283 = arith.mulf %278, %282 : vector<8x128xf32>
    %284 = arith.truncf %283 : vector<8x128xf32> to vector<8x128xbf16>
    %285 = arith.index_cast %c5_i32 : i32 to index
    %c0_83 = arith.constant 0 : index
    %c0_84 = arith.constant 0 : index
    %286 = vector.load %arg3[%285, %c0_83, %c0_84] : memref<8x8x128xbf16, #tpu.memory_space<vmem>>, vector<1x8x128xbf16>
    %287 = vector.shape_cast %286 : vector<1x8x128xbf16> to vector<8x128xbf16>
    %288 = vector.shape_cast %284 : vector<8x128xbf16> to vector<1x8x128xbf16>
    tpu.vector_store %arg3[%285, %c0_83, %c0_84], %288 {strides = array<i32>} : memref<8x8x128xbf16, #tpu.memory_space<vmem>>, vector<1x8x128xbf16>,
    %c6_i32 = arith.constant 6 : i32
    %289 = arith.index_cast %c6_i32 : i32 to index
    %c0_85 = arith.constant 0 : index
    %c0_86 = arith.constant 0 : index
    %c0_87 = arith.constant 0 : index
    %290 = vector.load %arg1[%289, %c0_85, %c0_86, %c0_87] : memref<8x4x8x128xf32, #tpu.memory_space<vmem>>, vector<1x4x8x128xf32>
    %291 = vector.shape_cast %290 : vector<1x4x8x128xf32> to vector<4x8x128xf32>
    %292 = arith.truncf %283 : vector<8x128xf32> to vector<8x128xbf16>
    %293 = vector.extract_strided_slice %291 {offsets = [0, 0, 0], sizes = [1, 8, 128], strides = [1, 1, 1]} : vector<4x8x128xf32> to vector<1x8x128xf32>
    %294 = vector.shape_cast %293 : vector<1x8x128xf32> to vector<8x128xf32>
    %cst_88 = arith.constant dense<0.000000e+00> : vector<8x128xf32>
    %295 = tpu.matmul %292, %4, %cst_88 {dimension_numbers = #tpu.dot_dimension_numbers<[1], [0], [0], [1], [0, 0, 1, 1], [], []>} : vector<8x128xbf16>, vector<128x128xbf16>, vector<8x128xf32> -> vector<8x128xf32>
    %296 = arith.addf %294, %295 : vector<8x128xf32>
    %297 = vector.extract_strided_slice %291 {offsets = [1, 0, 0], sizes = [1, 8, 128], strides = [1, 1, 1]} : vector<4x8x128xf32> to vector<1x8x128xf32>
    %298 = vector.shape_cast %297 : vector<1x8x128xf32> to vector<8x128xf32>
    %cst_89 = arith.constant dense<0.000000e+00> : vector<8x128xf32>
    %299 = tpu.matmul %292, %6, %cst_89 {dimension_numbers = #tpu.dot_dimension_numbers<[1], [0], [0], [1], [0, 0, 1, 1], [], []>} : vector<8x128xbf16>, vector<128x128xbf16>, vector<8x128xf32> -> vector<8x128xf32>
    %300 = arith.addf %298, %299 : vector<8x128xf32>
    %301 = vector.extract_strided_slice %291 {offsets = [2, 0, 0], sizes = [1, 8, 128], strides = [1, 1, 1]} : vector<4x8x128xf32> to vector<1x8x128xf32>
    %302 = vector.shape_cast %301 : vector<1x8x128xf32> to vector<8x128xf32>
    %cst_90 = arith.constant dense<0.000000e+00> : vector<8x128xf32>
    %303 = tpu.matmul %292, %8, %cst_90 {dimension_numbers = #tpu.dot_dimension_numbers<[1], [0], [0], [1], [0, 0, 1, 1], [], []>} : vector<8x128xbf16>, vector<128x128xbf16>, vector<8x128xf32> -> vector<8x128xf32>
    %304 = arith.addf %302, %303 : vector<8x128xf32>
    %305 = vector.extract_strided_slice %291 {offsets = [3, 0, 0], sizes = [1, 8, 128], strides = [1, 1, 1]} : vector<4x8x128xf32> to vector<1x8x128xf32>
    %306 = vector.shape_cast %305 : vector<1x8x128xf32> to vector<8x128xf32>
    %cst_91 = arith.constant dense<0.000000e+00> : vector<8x128xf32>
    %307 = tpu.matmul %292, %10, %cst_91 {dimension_numbers = #tpu.dot_dimension_numbers<[1], [0], [0], [1], [0, 0, 1, 1], [], []>} : vector<8x128xbf16>, vector<128x128xbf16>, vector<8x128xf32> -> vector<8x128xf32>
    %308 = arith.addf %306, %307 : vector<8x128xf32>
    %309 = arith.negf %296 : vector<8x128xf32>
    %310 = math.exp %309 : vector<8x128xf32>
    %cst_92 = arith.constant 1.000000e+00 : f32
    %311 = vector.broadcast %cst_92 : f32 to vector<8x128xf32>
    %312 = arith.addf %311, %310 : vector<8x128xf32>
    %313 = arith.divf %311, %312 : vector<8x128xf32>
    %314 = arith.negf %300 : vector<8x128xf32>
    %315 = math.exp %314 : vector<8x128xf32>
    %cst_93 = arith.constant 1.000000e+00 : f32
    %316 = vector.broadcast %cst_93 : f32 to vector<8x128xf32>
    %317 = arith.addf %316, %315 : vector<8x128xf32>
    %318 = arith.divf %316, %317 : vector<8x128xf32>
    %319 = math.tanh %304 : vector<8x128xf32>
    %320 = arith.negf %308 : vector<8x128xf32>
    %321 = math.exp %320 : vector<8x128xf32>
    %cst_94 = arith.constant 1.000000e+00 : f32
    %322 = vector.broadcast %cst_94 : f32 to vector<8x128xf32>
    %323 = arith.addf %322, %321 : vector<8x128xf32>
    %324 = arith.divf %322, %323 : vector<8x128xf32>
    %325 = arith.mulf %318, %281 : vector<8x128xf32>
    %326 = arith.mulf %313, %319 : vector<8x128xf32>
    %327 = arith.addf %325, %326 : vector<8x128xf32>
    %328 = math.tanh %327 : vector<8x128xf32>
    %329 = arith.mulf %324, %328 : vector<8x128xf32>
    %330 = arith.truncf %329 : vector<8x128xf32> to vector<8x128xbf16>
    %331 = arith.index_cast %c6_i32 : i32 to index
    %c0_95 = arith.constant 0 : index
    %c0_96 = arith.constant 0 : index
    %332 = vector.load %arg3[%331, %c0_95, %c0_96] : memref<8x8x128xbf16, #tpu.memory_space<vmem>>, vector<1x8x128xbf16>
    %333 = vector.shape_cast %332 : vector<1x8x128xbf16> to vector<8x128xbf16>
    %334 = vector.shape_cast %330 : vector<8x128xbf16> to vector<1x8x128xbf16>
    tpu.vector_store %arg3[%331, %c0_95, %c0_96], %334 {strides = array<i32>} : memref<8x8x128xbf16, #tpu.memory_space<vmem>>, vector<1x8x128xbf16>,
    %c7_i32 = arith.constant 7 : i32
    %335 = arith.index_cast %c7_i32 : i32 to index
    %c0_97 = arith.constant 0 : index
    %c0_98 = arith.constant 0 : index
    %c0_99 = arith.constant 0 : index
    %336 = vector.load %arg1[%335, %c0_97, %c0_98, %c0_99] : memref<8x4x8x128xf32, #tpu.memory_space<vmem>>, vector<1x4x8x128xf32>
    %337 = vector.shape_cast %336 : vector<1x4x8x128xf32> to vector<4x8x128xf32>
    %338 = arith.truncf %329 : vector<8x128xf32> to vector<8x128xbf16>
    %339 = vector.extract_strided_slice %337 {offsets = [0, 0, 0], sizes = [1, 8, 128], strides = [1, 1, 1]} : vector<4x8x128xf32> to vector<1x8x128xf32>
    %340 = vector.shape_cast %339 : vector<1x8x128xf32> to vector<8x128xf32>
    %cst_100 = arith.constant dense<0.000000e+00> : vector<8x128xf32>
    %341 = tpu.matmul %338, %4, %cst_100 {dimension_numbers = #tpu.dot_dimension_numbers<[1], [0], [0], [1], [0, 0, 1, 1], [], []>} : vector<8x128xbf16>, vector<128x128xbf16>, vector<8x128xf32> -> vector<8x128xf32>
    %342 = arith.addf %340, %341 : vector<8x128xf32>
    %343 = vector.extract_strided_slice %337 {offsets = [1, 0, 0], sizes = [1, 8, 128], strides = [1, 1, 1]} : vector<4x8x128xf32> to vector<1x8x128xf32>
    %344 = vector.shape_cast %343 : vector<1x8x128xf32> to vector<8x128xf32>
    %cst_101 = arith.constant dense<0.000000e+00> : vector<8x128xf32>
    %345 = tpu.matmul %338, %6, %cst_101 {dimension_numbers = #tpu.dot_dimension_numbers<[1], [0], [0], [1], [0, 0, 1, 1], [], []>} : vector<8x128xbf16>, vector<128x128xbf16>, vector<8x128xf32> -> vector<8x128xf32>
    %346 = arith.addf %344, %345 : vector<8x128xf32>
    %347 = vector.extract_strided_slice %337 {offsets = [2, 0, 0], sizes = [1, 8, 128], strides = [1, 1, 1]} : vector<4x8x128xf32> to vector<1x8x128xf32>
    %348 = vector.shape_cast %347 : vector<1x8x128xf32> to vector<8x128xf32>
    %cst_102 = arith.constant dense<0.000000e+00> : vector<8x128xf32>
    %349 = tpu.matmul %338, %8, %cst_102 {dimension_numbers = #tpu.dot_dimension_numbers<[1], [0], [0], [1], [0, 0, 1, 1], [], []>} : vector<8x128xbf16>, vector<128x128xbf16>, vector<8x128xf32> -> vector<8x128xf32>
    %350 = arith.addf %348, %349 : vector<8x128xf32>
    %351 = vector.extract_strided_slice %337 {offsets = [3, 0, 0], sizes = [1, 8, 128], strides = [1, 1, 1]} : vector<4x8x128xf32> to vector<1x8x128xf32>
    %352 = vector.shape_cast %351 : vector<1x8x128xf32> to vector<8x128xf32>
    %cst_103 = arith.constant dense<0.000000e+00> : vector<8x128xf32>
    %353 = tpu.matmul %338, %10, %cst_103 {dimension_numbers = #tpu.dot_dimension_numbers<[1], [0], [0], [1], [0, 0, 1, 1], [], []>} : vector<8x128xbf16>, vector<128x128xbf16>, vector<8x128xf32> -> vector<8x128xf32>
    %354 = arith.addf %352, %353 : vector<8x128xf32>
    %355 = arith.negf %342 : vector<8x128xf32>
    %356 = math.exp %355 : vector<8x128xf32>
    %cst_104 = arith.constant 1.000000e+00 : f32
    %357 = vector.broadcast %cst_104 : f32 to vector<8x128xf32>
    %358 = arith.addf %357, %356 : vector<8x128xf32>
    %359 = arith.divf %357, %358 : vector<8x128xf32>
    %360 = arith.negf %346 : vector<8x128xf32>
    %361 = math.exp %360 : vector<8x128xf32>
    %cst_105 = arith.constant 1.000000e+00 : f32
    %362 = vector.broadcast %cst_105 : f32 to vector<8x128xf32>
    %363 = arith.addf %362, %361 : vector<8x128xf32>
    %364 = arith.divf %362, %363 : vector<8x128xf32>
    %365 = math.tanh %350 : vector<8x128xf32>
    %366 = arith.negf %354 : vector<8x128xf32>
    %367 = math.exp %366 : vector<8x128xf32>
    %cst_106 = arith.constant 1.000000e+00 : f32
    %368 = vector.broadcast %cst_106 : f32 to vector<8x128xf32>
    %369 = arith.addf %368, %367 : vector<8x128xf32>
    %370 = arith.divf %368, %369 : vector<8x128xf32>
    %371 = arith.mulf %364, %327 : vector<8x128xf32>
    %372 = arith.mulf %359, %365 : vector<8x128xf32>
    %373 = arith.addf %371, %372 : vector<8x128xf32>
    %374 = math.tanh %373 : vector<8x128xf32>
    %375 = arith.mulf %370, %374 : vector<8x128xf32>
    %376 = arith.truncf %375 : vector<8x128xf32> to vector<8x128xbf16>
    %377 = arith.index_cast %c7_i32 : i32 to index
    %c0_107 = arith.constant 0 : index
    %c0_108 = arith.constant 0 : index
    %378 = vector.load %arg3[%377, %c0_107, %c0_108] : memref<8x8x128xbf16, #tpu.memory_space<vmem>>, vector<1x8x128xbf16>
    %379 = vector.shape_cast %378 : vector<1x8x128xbf16> to vector<8x128xbf16>
    %380 = vector.shape_cast %376 : vector<8x128xbf16> to vector<1x8x128xbf16>
    tpu.vector_store %arg3[%377, %c0_107, %c0_108], %380 {strides = array<i32>} : memref<8x8x128xbf16, #tpu.memory_space<vmem>>, vector<1x8x128xbf16>,
    %c8_i32 = arith.constant 8 : i32
    %c0_109 = arith.constant 0 : index
    %c0_110 = arith.constant 0 : index
    %381 = vector.load %arg4[%c0_109, %c0_110] : memref<8x128xf32, #tpu.memory_space<vmem>>, vector<8x128xf32>
    tpu.vector_store %arg4[%c0_109, %c0_110], %375 {strides = array<i32>} : memref<8x128xf32, #tpu.memory_space<vmem>>, vector<8x128xf32>,
    %c0_111 = arith.constant 0 : index
    %c0_112 = arith.constant 0 : index
    %382 = vector.load %arg5[%c0_111, %c0_112] : memref<8x128xf32, #tpu.memory_space<vmem>>, vector<8x128xf32>
    tpu.vector_store %arg5[%c0_111, %c0_112], %373 {strides = array<i32>} : memref<8x128xf32, #tpu.memory_space<vmem>>, vector<8x128xf32>,
    return
  }
  func.func @transform_0(%arg0: i32) -> (i32, i32, i32, i32) {
    %c0_i32 = arith.constant 0 : i32
    %c0_i32_0 = arith.constant 0 : i32
    %c0_i32_1 = arith.constant 0 : i32
    %c0_i32_2 = arith.constant 0 : i32
    return %arg0, %c0_i32, %c0_i32_0, %c0_i32_1 : i32, i32, i32, i32
  }
  func.func @transform_1(%arg0: i32) -> (i32, i32, i32) {
    %c0_i32 = arith.constant 0 : i32
    %c0_i32_0 = arith.constant 0 : i32
    %c0_i32_1 = arith.constant 0 : i32
    %c0_i32_2 = arith.constant 0 : i32
    return %c0_i32, %c0_i32_0, %c0_i32_1 : i32, i32, i32
  }
  func.func @transform_2(%arg0: i32) -> (i32, i32, i32) {
    %c0_i32 = arith.constant 0 : i32
    %c0_i32_0 = arith.constant 0 : i32
    %c0_i32_1 = arith.constant 0 : i32
    return %arg0, %c0_i32, %c0_i32_0 : i32, i32, i32
  }
  func.func @transform_3(%arg0: i32) -> (i32, i32) {
    %c0_i32 = arith.constant 0 : i32
    %c0_i32_0 = arith.constant 0 : i32
    %c0_i32_1 = arith.constant 0 : i32
    return %c0_i32, %c0_i32_0 : i32, i32
  }
  func.func @transform_4(%arg0: i32) -> (i32, i32) {
    %c0_i32 = arith.constant 0 : i32
    %c0_i32_0 = arith.constant 0 : i32
    %c0_i32_1 = arith.constant 0 : i32
    return %c0_i32, %c0_i32_0 : i32, i32
  }
}

module attributes {stable_mosaic.version = 11 : i64} {
  func.func @decoder_kernel(%arg0: i32, %arg1: i32, %arg2: memref<64x128xbf16, #tpu.memory_space<vmem>>, %arg3: memref<128x128xbf16, #tpu.memory_space<vmem>>, %arg4: memref<1x128xf32, #tpu.memory_space<vmem>>, %arg5: memref<64x128xf32, #tpu.memory_space<vmem>>) attributes {dimension_semantics = [#tpu.dimension_semantics<parallel>, #tpu.dimension_semantics<parallel>], iteration_bounds = array<i64: 1, 1>, scalar_prefetch = 0 : i64, scratch_operands = 0 : i64, tpu.core_type = #tpu.core_type<tc>, window_params = [{transform_indices = @transform_0, window_bounds = array<i64: 64, 128>}, {transform_indices = @transform_1, window_bounds = array<i64: 128, 128>}, {transform_indices = @transform_2, window_bounds = array<i64: 1, 128>}, {transform_indices = @transform_3, window_bounds = array<i64: 64, 128>}]} {
    %c0 = arith.constant 0 : index
    %c0_0 = arith.constant 0 : index
    %0 = vector.load %arg2[%c0, %c0_0] : memref<64x128xbf16, #tpu.memory_space<vmem>>, vector<64x128xbf16>
    %c0_1 = arith.constant 0 : index
    %c0_2 = arith.constant 0 : index
    %1 = vector.load %arg3[%c0_1, %c0_2] : memref<128x128xbf16, #tpu.memory_space<vmem>>, vector<128x128xbf16>
    %cst = arith.constant dense<0.000000e+00> : vector<64x128xf32>
    %2 = tpu.matmul %0, %1, %cst {dimension_numbers = #tpu.dot_dimension_numbers<[1], [0], [0], [1], [0, 0, 1, 1], [], []>} : vector<64x128xbf16>, vector<128x128xbf16>, vector<64x128xf32> -> vector<64x128xf32>
    %c0_3 = arith.constant 0 : index
    %c0_4 = arith.constant 0 : index
    %3 = vector.load %arg4[%c0_3, %c0_4] : memref<1x128xf32, #tpu.memory_space<vmem>>, vector<1x128xf32>
    %4 = vector.broadcast %3 : vector<1x128xf32> to vector<64x128xf32>
    %5 = arith.addf %2, %4 : vector<64x128xf32>
    %c0_5 = arith.constant 0 : index
    %c0_6 = arith.constant 0 : index
    %6 = vector.load %arg5[%c0_5, %c0_6] : memref<64x128xf32, #tpu.memory_space<vmem>>, vector<64x128xf32>
    tpu.vector_store %arg5[%c0_5, %c0_6], %5 {strides = array<i32>} : memref<64x128xf32, #tpu.memory_space<vmem>>, vector<64x128xf32>,
    return
  }
  func.func @transform_0(%arg0: i32, %arg1: i32) -> (i32, i32) {
    %c0_i32 = arith.constant 0 : i32
    %c0_i32_0 = arith.constant 0 : i32
    return %arg0, %c0_i32 : i32, i32
  }
  func.func @transform_1(%arg0: i32, %arg1: i32) -> (i32, i32) {
    %c0_i32 = arith.constant 0 : i32
    %c0_i32_0 = arith.constant 0 : i32
    return %c0_i32, %arg1 : i32, i32
  }
  func.func @transform_2(%arg0: i32, %arg1: i32) -> (i32, i32) {
    %c0_i32 = arith.constant 0 : i32
    %c0_i32_0 = arith.constant 0 : i32
    return %c0_i32, %arg1 : i32, i32
  }
  func.func @transform_3(%arg0: i32, %arg1: i32) -> (i32, i32) {
    %c0_i32 = arith.constant 0 : i32
    return %arg0, %arg1 : i32, i32
  }
}

</mosaic_0001>

<bundles_post_ra>
// kernel: text_generator_forward.3
= control target key start
LH: loop header
LB: loop body
LE: loop exit
PB: predicated region body
PF: predicated region fallthrough
CT: control target
= control target key end

     0   :  { %s355_s1 = inlined_call_operand.vmem [shape: bf16[128,128], index: 1, kind: input, shape index: {}]   ;;  %s356_s0 = inlined_call_operand.vmem [shape: bf16[64,128], index: 0, kind: input, shape index: {}]   ;;  %s357_s2 = inlined_call_operand.vmem [shape: f32[1,128], index: 2, kind: input, shape index: {}]   ;;  %s358_s3 = inlined_call_operand.vmem [shape: f32[64,128], index: 3, kind: output, shape index: {}]  }
   0x1   :  { %v260_v0 = vld [vmem:[%s355_s1] sm:$0xff]   ;;  %v261_v1 = vld [vmem:[%s355_s1 + $0x8] sm:$0xff]   ;;  %v262_v2 = vld [vmem:[%s355_s1 + $0x10] sm:$0xff]  }
   0x2   :  { %220 = vmatprep.subr.bf16.mxu0 %v260_v0  ;;  %244 = vmatprep.subr.bf16.mxu1 %v260_v0  ;;  %v263_v3 = vld [vmem:[%s355_s1 + $0x18] sm:$0xff]   ;;  %v268_v4 = vld [vmem:[%s356_s0] sm:$0xff]   ;;  %v269_v5 = vld [vmem:[%s356_s0 + $0x10] sm:$0xff]  }
   0x3   :  { %221 = vmatpush3.bf16.msra.mxu0 %v260_v0  ;;  %252 = vmatpush3.bf16.msra.mxu1 %v260_v0  ;;  %v264_v6 = vld [vmem:[%s355_s1 + $0x20] sm:$0xff]   ;;  %v265_v7 = vld [vmem:[%s355_s1 + $0x28] sm:$0xff]   ;;  %v266_v8 = vld [vmem:[%s355_s1 + $0x30] sm:$0xff]  }
   0x4   :  { %222 = vmatprep.subr.bf16.mxu0 %v261_v1  ;;  %245 = vmatprep.subr.bf16.mxu1 %v261_v1  ;;  %v267_v9 = vld [vmem:[%s355_s1 + $0x38] sm:$0xff]   ;;  %v270_v10 = vld [vmem:[%s356_s0 + $0x8] sm:$0xff]   ;;  %v195_v12 = vld [vmem:[%s357_s2] ss:$0 sm:$0xff] }
   0x5   :  { %236 = vmatprep.mubr.bf16.mxu0 %v268_v4  ;;  %240 = vmatprep.mubr.bf16.mxu1 %v269_v5  ;;  %v271_v11 = vld [vmem:[%s356_s0 + $0x18] sm:$0xff]  }
   0x7   :  { %223 = vmatpush3.bf16.msra.mxu0 %v261_v1  ;;  %253 = vmatpush3.bf16.msra.mxu1 %v261_v1 }
   0x8   :  { %224 = vmatprep.subr.bf16.mxu0 %v262_v2  ;;  %246 = vmatprep.subr.bf16.mxu1 %v262_v2 }
   0xb   :  { %225 = vmatpush3.bf16.msra.mxu0 %v262_v2  ;;  %254 = vmatpush3.bf16.msra.mxu1 %v262_v2 }
   0xc   :  { %226 = vmatprep.subr.bf16.mxu0 %v263_v3  ;;  %247 = vmatprep.subr.bf16.mxu1 %v263_v3 }
   0xf   :  { %227 = vmatpush3.bf16.msra.mxu0 %v263_v3  ;;  %255 = vmatpush3.bf16.msra.mxu1 %v263_v3 }
  0x10   :  { %228 = vmatprep.subr.bf16.mxu0 %v264_v6  ;;  %248 = vmatprep.subr.bf16.mxu1 %v264_v6 }
  0x13   :  { %229 = vmatpush3.bf16.msra.mxu0 %v264_v6  ;;  %256 = vmatpush3.bf16.msra.mxu1 %v264_v6 }
  0x14   :  { %230 = vmatprep.subr.bf16.mxu0 %v265_v7  ;;  %249 = vmatprep.subr.bf16.mxu1 %v265_v7 }
  0x17   :  { %231 = vmatpush3.bf16.msra.mxu0 %v265_v7  ;;  %257 = vmatpush3.bf16.msra.mxu1 %v265_v7 }
  0x18   :  { %232 = vmatprep.subr.bf16.mxu0 %v266_v8  ;;  %250 = vmatprep.subr.bf16.mxu1 %v266_v8 }
  0x1b   :  { %233 = vmatpush3.bf16.msra.mxu0 %v266_v8  ;;  %258 = vmatpush3.bf16.msra.mxu1 %v266_v8 }
  0x1c   :  { %234 = vmatprep.subr.bf16.mxu0 %v267_v9  ;;  %251 = vmatprep.subr.bf16.mxu1 %v267_v9 }
  0x1f   :  { %235 = vmatpush3.bf16.msra.mxu0 %v267_v9  ;;  %259 = vmatpush3.bf16.msra.mxu1 %v267_v9 }
  0x22   :  { %237 = vmatmul.mubr.bf16.vlgmr.msra.gmra.mrb[0].mxu0 %v270_v10  ;;  %241 = vmatmul.mubr.bf16.vlgmr.msra.gmra.mrb[0].mxu1 %v271_v11 }
  0xf5   :  { %v238_v13 = vpop.f32.mrb[0].mxu0  ;;  %v242_v14 = vpop.f32.mrb[0].mxu1 }
  0xf6   :  { %v161_v15 = vadd.f32 %v238_v13, %v195_v12  ;;  %v177_v16 = vadd.f32 %v242_v14, %v195_v12  ;;  %v152_v17 = vpop.f32.mrb[1].mxu0  ;;  %v168_v18 = vpop.f32.mrb[1].mxu1 }
  0xf7   :  { %v153_v19 = vadd.f32 %v195_v12, %v152_v17  ;;  %v169_v20 = vadd.f32 %v195_v12, %v168_v18  ;;  %v239_v21 = vpop.f32.mrb[2].mxu0  ;;  %v243_v22 = vpop.f32.mrb[2].mxu1 }
  0xf8   :  { %185 = vst [vmem:[%s358_s3 + $0x10] sm:$0xff] %v161_v15  ;;  %189 = vst [vmem:[%s358_s3 + $0x30] sm:$0xff] %v177_v16  ;;  %v164_v23 = vadd.f32 %v239_v21, %v195_v12  ;;  %v180_v24 = vadd.f32 %v243_v22, %v195_v12  ;;  %v155_v25 = vpop.f32.mrb[3].mxu0  ;;  %v171_v26 = vpop.f32.mrb[3].mxu1 }
  0xf9   :  { %183 = vst [vmem:[%s358_s3] sm:$0xff] %v153_v19  ;;  %187 = vst [vmem:[%s358_s3 + $0x20] sm:$0xff] %v169_v20  ;;  %v156_v27 = vadd.f32 %v195_v12, %v155_v25  ;;  %v172_v28 = vadd.f32 %v195_v12, %v171_v26 }
  0xfa   :  { %186 = vst [vmem:[%s358_s3 + $0x18] sm:$0xff] %v164_v23  ;;  %190 = vst [vmem:[%s358_s3 + $0x38] sm:$0xff] %v180_v24 }
  0xfb   :  { %184 = vst [vmem:[%s358_s3 + $0x8] sm:$0xff] %v156_v27  ;;  %188 = vst [vmem:[%s358_s3 + $0x28] sm:$0xff] %v172_v28 }

// kernel: text_generator_forward.2
= control target key start
LH: loop header
LB: loop body
LE: loop exit
PB: predicated region body
PF: predicated region fallthrough
CT: control target
= control target key end

     0   :  { %v3124_v0 = vmov 0.0   ;;  %vm3125_vm0 = vmmov 0   ;;  %v3126_v19 = vmov 0.0|0.0   ;;  %s4202_s1 = inlined_call_operand.vmem [shape: bf16[4,128,128], index: 1, kind: input, shape index: {}]   ;;  %s4203_s0 = inlined_call_operand.vmem [shape: f32[8,4,8,128], index: 0, kind: input, shape index: {}]   ;;  %s4204_s2 = inlined_call_operand.vmem [shape: bf16[8,8,128], index: 2, kind: output, shape index: {0}]   ;;  %s4205_s4 = inlined_call_operand.vmem [shape: f32[8,128], index: 4, kind: output, shape index: {2}]   ;;  %s4206_s3 = inlined_call_operand.vmem [shape: f32[8,128], index: 3, kind: output, shape index: {1}]  }
   0x1   :  { %2290 = vmatprep.subr.bf16.mxu0 %v3124_v0  ;;  %2310 = vmatprep.subr.bf16.mxu1 %v3124_v0  ;;  %v3157_v1 = vld [vmem:[%s4202_s1] sm:$0xff]   ;;  %v3172_v3 = vld [vmem:[%s4202_s1 + $0x8] sm:$0xff]   ;;  %v3186_v5 = vld [vmem:[%s4202_s1 + $0x10] sm:$0xff]  }
   0x2   :  { %v3162_v2 = vld [vmem:[%s4202_s1 + $0x40] sm:$0xff]   ;;  %2306 = vmatprep.mubr.msk.bf16.mxu0 %vm3125_vm0, %v3124_v0  ;;  %2326 = vmatprep.mubr.msk.bf16.mxu1 %vm3125_vm0, %v3124_v0  ;;  %v3179_v4 = vld [vmem:[%s4202_s1 + $0x48] sm:$0xff]   ;;  %v3193_v6 = vld [vmem:[%s4202_s1 + $0x50] sm:$0xff]  }
   0x3   :  { %2291 = vmatpush3.bf16.msra.mxu0 %v3157_v1  ;;  %2311 = vmatpush3.bf16.msra.mxu1 %v3162_v2  ;;  %v3200_v7 = vld [vmem:[%s4202_s1 + $0x18] sm:$0xff]   ;;  %v3214_v9 = vld [vmem:[%s4202_s1 + $0x20] sm:$0xff]   ;;  %v3228_v11 = vld [vmem:[%s4202_s1 + $0x28] sm:$0xff]  }
   0x4   :  { %2292 = vmatprep.subr.bf16.mxu0 %v3124_v0  ;;  %2312 = vmatprep.subr.bf16.mxu1 %v3124_v0  ;;  %v3207_v8 = vld [vmem:[%s4202_s1 + $0x58] sm:$0xff]   ;;  %v3221_v10 = vld [vmem:[%s4202_s1 + $0x60] sm:$0xff]   ;;  %v3235_v12 = vld [vmem:[%s4202_s1 + $0x68] sm:$0xff]  }
   0x5   :  { %v3242_v13 = vld [vmem:[%s4202_s1 + $0x30] sm:$0xff]   ;;  %v3256_v15 = vld [vmem:[%s4202_s1 + $0x38] sm:$0xff]   ;;  %v3270_v17 = vld [vmem:[%s4202_s1 + $0x80] sm:$0xff]  }
   0x6   :  { %v3249_v14 = vld [vmem:[%s4202_s1 + $0x70] sm:$0xff]   ;;  %v3263_v16 = vld [vmem:[%s4202_s1 + $0x78] sm:$0xff]   ;;  %v3277_v18 = vld [vmem:[%s4202_s1 + $0xc0] sm:$0xff]  }
   0x7   :  { %2293 = vmatpush3.bf16.msra.mxu0 %v3172_v3  ;;  %2313 = vmatpush3.bf16.msra.mxu1 %v3179_v4  ;;  %v3284_v20 = vld [vmem:[%s4202_s1 + $0x88] sm:$0xff]   ;;  %v3302_v22 = vld [vmem:[%s4202_s1 + $0x90] sm:$0xff]   ;;  %v3316_v24 = vld [vmem:[%s4202_s1 + $0x98] sm:$0xff]  }
   0x8   :  { %2294 = vmatprep.subr.bf16.mxu0 %v3124_v0  ;;  %2314 = vmatprep.subr.bf16.mxu1 %v3124_v0  ;;  %v3291_v21 = vld [vmem:[%s4202_s1 + $0xc8] sm:$0xff]   ;;  %v3309_v23 = vld [vmem:[%s4202_s1 + $0xd0] sm:$0xff]   ;;  %v3323_v25 = vld [vmem:[%s4202_s1 + $0xd8] sm:$0xff]  }
   0x9   :  { %v3330_v26 = vld [vmem:[%s4202_s1 + $0xa0] sm:$0xff]   ;;  %v3344_v28 = vld [vmem:[%s4202_s1 + $0xa8] sm:$0xff]   ;;  %v3358_v30 = vld [vmem:[%s4202_s1 + $0xb0] sm:$0xff]  }
   0xa   :  { %v3337_v27 = vld [vmem:[%s4202_s1 + $0xe0] sm:$0xff]   ;;  %v3351_v29 = vld [vmem:[%s4202_s1 + $0xe8] sm:$0xff]   ;;  %v3365_v31 = vld [vmem:[%s4202_s1 + $0xf0] sm:$0xff]  }
   0xb   :  { %2295 = vmatpush3.bf16.msra.mxu0 %v3186_v5  ;;  %2315 = vmatpush3.bf16.msra.mxu1 %v3193_v6  ;;  %v3372_v32 = vld [vmem:[%s4202_s1 + $0xb8] sm:$0xff]   ;;  %v91_v42 = vld [vmem:[%s4203_s0 + $0x8] sm:$0xff]  ;;  %v90_v43 = vld [vmem:[%s4203_s0] sm:$0xff] }
   0xc   :  { %2296 = vmatprep.subr.bf16.mxu0 %v3124_v0  ;;  %2316 = vmatprep.subr.bf16.mxu1 %v3124_v0  ;;  %v3379_v33 = vld [vmem:[%s4202_s1 + $0xf8] sm:$0xff]   ;;  %v92_v52 = vld [vmem:[%s4203_s0 + $0x10] sm:$0xff] }
   0xd   :  { %v93_v53 = vld [vmem:[%s4203_s0 + $0x18] sm:$0xff] }
   0xf   :  { %2297 = vmatpush3.bf16.msra.mxu0 %v3200_v7  ;;  %2317 = vmatpush3.bf16.msra.mxu1 %v3207_v8 }
  0x10   :  { %2298 = vmatprep.subr.bf16.mxu0 %v3124_v0  ;;  %2318 = vmatprep.subr.bf16.mxu1 %v3124_v0 }
  0x13   :  { %2299 = vmatpush3.bf16.msra.mxu0 %v3214_v9  ;;  %2319 = vmatpush3.bf16.msra.mxu1 %v3221_v10 }
  0x14   :  { %2300 = vmatprep.subr.bf16.mxu0 %v3124_v0  ;;  %2320 = vmatprep.subr.bf16.mxu1 %v3124_v0 }
  0x17   :  { %2301 = vmatpush3.bf16.msra.mxu0 %v3228_v11  ;;  %2321 = vmatpush3.bf16.msra.mxu1 %v3235_v12 }
  0x18   :  { %2302 = vmatprep.subr.bf16.mxu0 %v3124_v0  ;;  %2322 = vmatprep.subr.bf16.mxu1 %v3124_v0 }
  0x1b   :  { %2303 = vmatpush3.bf16.msra.mxu0 %v3242_v13  ;;  %2323 = vmatpush3.bf16.msra.mxu1 %v3249_v14 }
  0x1c   :  { %2304 = vmatprep.subr.bf16.mxu0 %v3124_v0  ;;  %2324 = vmatprep.subr.bf16.mxu1 %v3124_v0 }
  0x1f   :  { %2305 = vmatpush3.bf16.msra.mxu0 %v3256_v15  ;;  %2325 = vmatpush3.bf16.msra.mxu1 %v3263_v16 }
  0x20   :  { %2330 = vmatprep.subr.bf16.mxu0 %v3124_v0  ;;  %2350 = vmatprep.subr.bf16.mxu1 %v3124_v0 }
  0x22   :  { %2307 = vmatmul.mubr.bf16.vlgmr.msra.gmra.mrb[0].mxu0 %v3126_v19  ;;  %2327 = vmatmul.mubr.bf16.vlgmr.msra.gmra.mrb[0].mxu1 %v3126_v19 }
  0x23   :  { %2331 = vmatpush3.bf16.msra.mxu0 %v3270_v17  ;;  %2351 = vmatpush3.bf16.msra.mxu1 %v3277_v18 }
  0x24   :  { %2332 = vmatprep.subr.bf16.mxu0 %v3124_v0  ;;  %2352 = vmatprep.subr.bf16.mxu1 %v3124_v0 }
  0x25   :  { %2346 = vmatprep.mubr.msk.bf16.mxu0 %vm3125_vm0, %v3124_v0  ;;  %2366 = vmatprep.mubr.msk.bf16.mxu1 %vm3125_vm0, %v3124_v0 }
  0x27   :  { %2333 = vmatpush3.bf16.msra.mxu0 %v3284_v20  ;;  %2353 = vmatpush3.bf16.msra.mxu1 %v3291_v21 }
  0x28   :  { %2334 = vmatprep.subr.bf16.mxu0 %v3124_v0  ;;  %2354 = vmatprep.subr.bf16.mxu1 %v3124_v0 }
  0x2b   :  { %2335 = vmatpush3.bf16.msra.mxu0 %v3302_v22  ;;  %2355 = vmatpush3.bf16.msra.mxu1 %v3309_v23 }
  0x2c   :  { %2336 = vmatprep.subr.bf16.mxu0 %v3124_v0  ;;  %2356 = vmatprep.subr.bf16.mxu1 %v3124_v0 }
  0x2f   :  { %2337 = vmatpush3.bf16.msra.mxu0 %v3316_v24  ;;  %2357 = vmatpush3.bf16.msra.mxu1 %v3323_v25 }
  0x30   :  { %2338 = vmatprep.subr.bf16.mxu0 %v3124_v0  ;;  %2358 = vmatprep.subr.bf16.mxu1 %v3124_v0 }
  0x33   :  { %2339 = vmatpush3.bf16.msra.mxu0 %v3330_v26  ;;  %2359 = vmatpush3.bf16.msra.mxu1 %v3337_v27 }
  0x34   :  { %2340 = vmatprep.subr.bf16.mxu0 %v3124_v0  ;;  %2360 = vmatprep.subr.bf16.mxu1 %v3124_v0 }
  0x37   :  { %2341 = vmatpush3.bf16.msra.mxu0 %v3344_v28  ;;  %2361 = vmatpush3.bf16.msra.mxu1 %v3351_v29 }
  0x38   :  { %2342 = vmatprep.subr.bf16.mxu0 %v3124_v0  ;;  %2362 = vmatprep.subr.bf16.mxu1 %v3124_v0 }
  0x3b   :  { %2343 = vmatpush3.bf16.msra.mxu0 %v3358_v30  ;;  %2363 = vmatpush3.bf16.msra.mxu1 %v3365_v31 }
  0x3c   :  { %2344 = vmatprep.subr.bf16.mxu0 %v3124_v0  ;;  %2364 = vmatprep.subr.bf16.mxu1 %v3124_v0 }
  0x3f   :  { %2345 = vmatpush3.bf16.msra.mxu0 %v3372_v32  ;;  %2365 = vmatpush3.bf16.msra.mxu1 %v3379_v33 }
  0x40   :  { %2370 = vmatprep.subr.bf16.mxu0 %v3124_v0  ;;  %2390 = vmatprep.subr.bf16.mxu1 %v3124_v0 }
  0x42   :  { %2347 = vmatmul.mubr.bf16.vlgmr.msra.gmra.mrb[4].mxu0 %v3126_v19  ;;  %2367 = vmatmul.mubr.bf16.vlgmr.msra.gmra.mrb[4].mxu1 %v3126_v19 }
  0x43   :  { %2371 = vmatpush3.bf16.msra.mxu0 %v3157_v1  ;;  %2391 = vmatpush3.bf16.msra.mxu1 %v3162_v2 }
  0x44   :  { %2372 = vmatprep.subr.bf16.mxu0 %v3124_v0  ;;  %2392 = vmatprep.subr.bf16.mxu1 %v3124_v0 }
  0x45   :  { %2386 = vmatprep.mubr.msk.bf16.mxu0 %vm3125_vm0, %v3124_v0  ;;  %2406 = vmatprep.mubr.msk.bf16.mxu1 %vm3125_vm0, %v3124_v0 }
  0x47   :  { %2373 = vmatpush3.bf16.msra.mxu0 %v3172_v3  ;;  %2393 = vmatpush3.bf16.msra.mxu1 %v3179_v4 }
  0x48   :  { %2374 = vmatprep.subr.bf16.mxu0 %v3124_v0  ;;  %2394 = vmatprep.subr.bf16.mxu1 %v3124_v0 }
  0x4b   :  { %2375 = vmatpush3.bf16.msra.mxu0 %v3186_v5  ;;  %2395 = vmatpush3.bf16.msra.mxu1 %v3193_v6 }
  0x4c   :  { %2376 = vmatprep.subr.bf16.mxu0 %v3124_v0  ;;  %2396 = vmatprep.subr.bf16.mxu1 %v3124_v0 }
  0x4f   :  { %2377 = vmatpush3.bf16.msra.mxu0 %v3200_v7  ;;  %2397 = vmatpush3.bf16.msra.mxu1 %v3207_v8 }
  0x50   :  { %2378 = vmatprep.subr.bf16.mxu0 %v3124_v0  ;;  %2398 = vmatprep.subr.bf16.mxu1 %v3124_v0 }
  0x53   :  { %2379 = vmatpush3.bf16.msra.mxu0 %v3214_v9  ;;  %2399 = vmatpush3.bf16.msra.mxu1 %v3221_v10 }
  0x54   :  { %2380 = vmatprep.subr.bf16.mxu0 %v3124_v0  ;;  %2400 = vmatprep.subr.bf16.mxu1 %v3124_v0 }
  0x57   :  { %2381 = vmatpush3.bf16.msra.mxu0 %v3228_v11  ;;  %2401 = vmatpush3.bf16.msra.mxu1 %v3235_v12 }
  0x58   :  { %2382 = vmatprep.subr.bf16.mxu0 %v3124_v0  ;;  %2402 = vmatprep.subr.bf16.mxu1 %v3124_v0 }
  0x5b   :  { %2383 = vmatpush3.bf16.msra.mxu0 %v3242_v13  ;;  %2403 = vmatpush3.bf16.msra.mxu1 %v3249_v14 }
  0x5c   :  { %2384 = vmatprep.subr.bf16.mxu0 %v3124_v0  ;;  %2404 = vmatprep.subr.bf16.mxu1 %v3124_v0 }
  0x5f   :  { %2385 = vmatpush3.bf16.msra.mxu0 %v3256_v15  ;;  %2405 = vmatpush3.bf16.msra.mxu1 %v3263_v16 }
  0x60   :  { %2410 = vmatprep.subr.bf16.mxu0 %v3124_v0  ;;  %2430 = vmatprep.subr.bf16.mxu1 %v3124_v0 }
  0xf5   :  { %v177_v34 = vpop.f32.mrb[0].mxu0  ;;  %v266_v35 = vpop.f32.mrb[0].mxu1 }
  0xf6   :  { %v2308_v36 = vpop.f32.mrb[1].mxu0  ;;  %v2328_v37 = vpop.f32.mrb[1].mxu1  ;;  %v272_v44 = vadd.f32 %v266_v35, %v91_v42  ;;  %v183_v45 = vadd.f32 %v177_v34, %v90_v43 }
  0xf7   :  { %v180_v38 = vpop.f32.mrb[2].mxu0  ;;  %v269_v39 = vpop.f32.mrb[2].mxu1 }
  0xf8   :  { %v2309_v40 = vpop.f32.mrb[3].mxu0  ;;  %v2329_v41 = vpop.f32.mrb[3].mxu1  ;;  %v1944_v46 = vmul.f32 -1.442695, %v272_v44  ;;  %v1943_v47 = vmul.f32 -1.442695, %v183_v45 }
  0xfa   :  { %2964 = vpow2.f32 %v1944_v46 }
  0xfb   :  { %2966 = vpow2.f32 %v1943_v47 }
 0x104   :  { %v2965_v48 = vpop.eup %2964 }
 0x105   :  { %v2967_v49 = vpop.eup %2966  ;;  %v460_v50 = vadd.f32 1.0, %v2965_v48 }
 0x106   :  { %v454_v51 = vadd.f32 1.0, %v2967_v49 }
 0x107   :  { %2968 = vrcp.f32 %v460_v50 }
 0x108   :  { %2970 = vrcp.f32 %v454_v51 }
 0x111   :  { %v2969_v34 = vpop.eup %2968 }
 0x112   :  { %v2971_v35 = vpop.eup %2970  ;;  %v470_v37 = vmul.f32 0.0, %v2969_v34  ;;  %v1949_v34 = vld [vmem:[%s4203_s0 + $0x38] sm:$0xff] }
 0x115   :  { %v355_v54 = vpop.f32.mrb[4].mxu0  ;;  %v444_v56 = vpop.f32.mrb[4].mxu1 }
 0x116   :  { %v361_v55 = vadd.f32 %v355_v54, %v92_v52  ;;  %v2348_v57 = vpop.f32.mrb[5].mxu0  ;;  %v450_v58 = vadd.f32 %v444_v56, %v93_v53  ;;  %v2368_v59 = vpop.f32.mrb[5].mxu1  ;;  %v1947_v54 = vld [vmem:[%s4203_s0 + $0x28] sm:$0xff] }
 0x117   :  { %v358_v60 = vpop.f32.mrb[6].mxu0  ;;  %v447_v61 = vpop.f32.mrb[6].mxu1 }
 0x118   :  { %2972 = vtanh.f32 %v361_v55  ;;  %v2349_v62 = vpop.f32.mrb[7].mxu0  ;;  %v1945_v63 = vmul.f32 -1.442695, %v450_v58  ;;  %v2369_v19 = vpop.f32.mrb[7].mxu1  ;;  %v1946_v55 = vld [vmem:[%s4203_s0 + $0x20] sm:$0xff] }
 0x119   :  { %v1948_v19 = vld [vmem:[%s4203_s0 + $0x30] sm:$0xff] }
 0x11a   :  { %2974 = vpow2.f32 %v1945_v63 }
 0x122   :  { %v2973_v36 = vpop.eup %2972 }
 0x123   :  { %v471_v38 = vmul.f32 %v2973_v36, %v2971_v35 }
 0x124   :  { %v2975_v39 = vpop.eup %2974 }
 0x125   :  { %v3434_v40 = vadd.f32 %v471_v38, %v470_v37  ;;  %v467_v41 = vadd.f32 1.0, %v2975_v39 }
 0x127   :  { %2976 = vtanh.f32 %v3434_v40 }
 0x128   :  { %2978 = vrcp.f32 %v467_v41 }
 0x131   :  { %v2977_v42 = vpop.eup %2976 }
 0x132   :  { %v2979_v43 = vpop.eup %2978 }
 0x133   :  { %v474_v44 = vmul.f32 %v2979_v43, %v2977_v42 }
 0x135   :  { %v475_v45 = vpack.c.bf16 %v474_v44, %v474_v44 }
 0x137   :  { %476 = vst [vmem:[%s4204_s2] sm:$0xf] %v475_v45  ;;  %2387 = vmatmul.mubr.bf16.vlgmr.msra.gmra.mrb[8].mxu0 %v475_v45  ;;  %2407 = vmatmul.mubr.bf16.vlgmr.msra.gmra.mrb[8].mxu1 %v475_v45 }
 0x138   :  { %2411 = vmatpush3.bf16.msra.mxu0 %v3270_v17  ;;  %2431 = vmatpush3.bf16.msra.mxu1 %v3277_v18 }
 0x139   :  { %2412 = vmatprep.subr.bf16.mxu0 %v3124_v0  ;;  %2432 = vmatprep.subr.bf16.mxu1 %v3124_v0 }
 0x13a   :  { %2426 = vmatprep.mubr.msk.bf16.mxu0 %vm3125_vm0, %v3124_v0  ;;  %2446 = vmatprep.mubr.msk.bf16.mxu1 %vm3125_vm0, %v3124_v0 }
 0x13c   :  { %2413 = vmatpush3.bf16.msra.mxu0 %v3284_v20  ;;  %2433 = vmatpush3.bf16.msra.mxu1 %v3291_v21 }
 0x13d   :  { %2414 = vmatprep.subr.bf16.mxu0 %v3124_v0  ;;  %2434 = vmatprep.subr.bf16.mxu1 %v3124_v0 }
 0x140   :  { %2415 = vmatpush3.bf16.msra.mxu0 %v3302_v22  ;;  %2435 = vmatpush3.bf16.msra.mxu1 %v3309_v23 }
 0x141   :  { %2416 = vmatprep.subr.bf16.mxu0 %v3124_v0  ;;  %2436 = vmatprep.subr.bf16.mxu1 %v3124_v0 }
 0x144   :  { %2417 = vmatpush3.bf16.msra.mxu0 %v3316_v24  ;;  %2437 = vmatpush3.bf16.msra.mxu1 %v3323_v25 }
 0x145   :  { %2418 = vmatprep.subr.bf16.mxu0 %v3124_v0  ;;  %2438 = vmatprep.subr.bf16.mxu1 %v3124_v0 }
 0x148   :  { %2419 = vmatpush3.bf16.msra.mxu0 %v3330_v26  ;;  %2439 = vmatpush3.bf16.msra.mxu1 %v3337_v27 }
 0x149   :  { %2420 = vmatprep.subr.bf16.mxu0 %v3124_v0  ;;  %2440 = vmatprep.subr.bf16.mxu1 %v3124_v0 }
 0x14c   :  { %2421 = vmatpush3.bf16.msra.mxu0 %v3344_v28  ;;  %2441 = vmatpush3.bf16.msra.mxu1 %v3351_v29 }
 0x14d   :  { %2422 = vmatprep.subr.bf16.mxu0 %v3124_v0  ;;  %2442 = vmatprep.subr.bf16.mxu1 %v3124_v0 }
 0x150   :  { %2423 = vmatpush3.bf16.msra.mxu0 %v3358_v30  ;;  %2443 = vmatpush3.bf16.msra.mxu1 %v3365_v31 }
 0x151   :  { %2424 = vmatprep.subr.bf16.mxu0 %v3124_v0  ;;  %2444 = vmatprep.subr.bf16.mxu1 %v3124_v0 }
 0x154   :  { %2425 = vmatpush3.bf16.msra.mxu0 %v3372_v32  ;;  %2445 = vmatpush3.bf16.msra.mxu1 %v3379_v33 }
 0x155   :  { %2450 = vmatprep.subr.bf16.mxu0 %v3124_v0  ;;  %2470 = vmatprep.subr.bf16.mxu1 %v3124_v0 }
 0x157   :  { %2427 = vmatmul.mubr.bf16.vlgmr.msra.gmra.mrb[12].mxu0 %v475_v45  ;;  %2447 = vmatmul.mubr.bf16.vlgmr.msra.gmra.mrb[12].mxu1 %v475_v45 }
 0x158   :  { %2451 = vmatpush3.bf16.msra.mxu0 %v3157_v1  ;;  %2471 = vmatpush3.bf16.msra.mxu1 %v3162_v2 }
 0x159   :  { %2452 = vmatprep.subr.bf16.mxu0 %v3124_v0  ;;  %2472 = vmatprep.subr.bf16.mxu1 %v3124_v0 }
 0x15a   :  { %2466 = vmatprep.mubr.msk.bf16.mxu0 %vm3125_vm0, %v3124_v0  ;;  %2486 = vmatprep.mubr.msk.bf16.mxu1 %vm3125_vm0, %v3124_v0 }
 0x15c   :  { %2453 = vmatpush3.bf16.msra.mxu0 %v3172_v3  ;;  %2473 = vmatpush3.bf16.msra.mxu1 %v3179_v4 }
 0x15d   :  { %2454 = vmatprep.subr.bf16.mxu0 %v3124_v0  ;;  %2474 = vmatprep.subr.bf16.mxu1 %v3124_v0 }
 0x160   :  { %2455 = vmatpush3.bf16.msra.mxu0 %v3186_v5  ;;  %2475 = vmatpush3.bf16.msra.mxu1 %v3193_v6 }
 0x161   :  { %2456 = vmatprep.subr.bf16.mxu0 %v3124_v0  ;;  %2476 = vmatprep.subr.bf16.mxu1 %v3124_v0 }
 0x164   :  { %2457 = vmatpush3.bf16.msra.mxu0 %v3200_v7  ;;  %2477 = vmatpush3.bf16.msra.mxu1 %v3207_v8 }
 0x165   :  { %2458 = vmatprep.subr.bf16.mxu0 %v3124_v0  ;;  %2478 = vmatprep.subr.bf16.mxu1 %v3124_v0 }
 0x168   :  { %2459 = vmatpush3.bf16.msra.mxu0 %v3214_v9  ;;  %2479 = vmatpush3.bf16.msra.mxu1 %v3221_v10 }
 0x169   :  { %2460 = vmatprep.subr.bf16.mxu0 %v3124_v0  ;;  %2480 = vmatprep.subr.bf16.mxu1 %v3124_v0 }
 0x16c   :  { %2461 = vmatpush3.bf16.msra.mxu0 %v3228_v11  ;;  %2481 = vmatpush3.bf16.msra.mxu1 %v3235_v12 }
 0x16d   :  { %2462 = vmatprep.subr.bf16.mxu0 %v3124_v0  ;;  %2482 = vmatprep.subr.bf16.mxu1 %v3124_v0 }
 0x170   :  { %2463 = vmatpush3.bf16.msra.mxu0 %v3242_v13  ;;  %2483 = vmatpush3.bf16.msra.mxu1 %v3249_v14 }
 0x171   :  { %2464 = vmatprep.subr.bf16.mxu0 %v3124_v0  ;;  %2484 = vmatprep.subr.bf16.mxu1 %v3124_v0 }
 0x174   :  { %2465 = vmatpush3.bf16.msra.mxu0 %v3256_v15  ;;  %2485 = vmatpush3.bf16.msra.mxu1 %v3263_v16 }
 0x175   :  { %2490 = vmatprep.subr.bf16.mxu0 %v3124_v0  ;;  %2510 = vmatprep.subr.bf16.mxu1 %v3124_v0 }
 0x20a   :  { %v516_v46 = vpop.f32.mrb[8].mxu0  ;;  %v557_v47 = vpop.f32.mrb[8].mxu1 }
 0x20b   :  { %v2388_v48 = vpop.f32.mrb[9].mxu0  ;;  %v2408_v49 = vpop.f32.mrb[9].mxu1  ;;  %v563_v56 = vadd.f32 %v1947_v54, %v557_v47  ;;  %v522_v57 = vadd.f32 %v1946_v55, %v516_v46 }
 0x20c   :  { %v519_v50 = vpop.f32.mrb[10].mxu0  ;;  %v560_v51 = vpop.f32.mrb[10].mxu1 }
 0x20d   :  { %v2389_v52 = vpop.f32.mrb[11].mxu0  ;;  %v2409_v53 = vpop.f32.mrb[11].mxu1  ;;  %v1951_v58 = vmul.f32 -1.442695, %v563_v56  ;;  %v1950_v59 = vmul.f32 -1.442695, %v522_v57 }
 0x20f   :  { %2980 = vpow2.f32 %v1951_v58 }
 0x210   :  { %2982 = vpow2.f32 %v1950_v59  ;;  %v1954_v59 = vld [vmem:[%s4203_s0 + $0x40] sm:$0xff] }
 0x219   :  { %v2981_v60 = vpop.eup %2980 }
 0x21a   :  { %v2983_v61 = vpop.eup %2982  ;;  %v655_v62 = vadd.f32 1.0, %v2981_v60 }
 0x21b   :  { %v649_v63 = vadd.f32 1.0, %v2983_v61 }
 0x21c   :  { %2984 = vrcp.f32 %v655_v62 }
 0x21d   :  { %2986 = vrcp.f32 %v649_v63 }
 0x226   :  { %v2985_v47 = vpop.eup %2984 }
 0x227   :  { %v2987_v48 = vpop.eup %2986  ;;  %v665_v50 = vmul.f32 %v2985_v47, %v3434_v40  ;;  %v1955_v40 = vld [vmem:[%s4203_s0 + $0x48] sm:$0xff] }
 0x22a   :  { %v598_v35 = vpop.f32.mrb[12].mxu0  ;;  %v639_v36 = vpop.f32.mrb[12].mxu1 }
 0x22b   :  { %v604_v37 = vadd.f32 %v1948_v19, %v598_v35  ;;  %v645_v38 = vadd.f32 %v1949_v34, %v639_v36  ;;  %v2428_v39 = vpop.f32.mrb[13].mxu0  ;;  %v2448_v41 = vpop.f32.mrb[13].mxu1 }
 0x22c   :  { %v601_v42 = vpop.f32.mrb[14].mxu0  ;;  %v642_v43 = vpop.f32.mrb[14].mxu1 }
 0x22d   :  { %2988 = vtanh.f32 %v604_v37  ;;  %v1952_v44 = vmul.f32 -1.442695, %v645_v38  ;;  %v2429_v45 = vpop.f32.mrb[15].mxu0  ;;  %v2449_v46 = vpop.f32.mrb[15].mxu1  ;;  %v1956_v37 = vld [vmem:[%s4203_s0 + $0x50] sm:$0xff]  ;;  %v1957_v38 = vld [vmem:[%s4203_s0 + $0x58] sm:$0xff] }
 0x22f   :  { %2990 = vpow2.f32 %v1952_v44 }
 0x237   :  { %v2989_v49 = vpop.eup %2988 }
 0x238   :  { %v666_v51 = vmul.f32 %v2989_v49, %v2987_v48 }
 0x239   :  { %v2991_v52 = vpop.eup %2990 }
 0x23a   :  { %v3525_v53 = vadd.f32 %v666_v51, %v665_v50  ;;  %v662_v54 = vadd.f32 1.0, %v2991_v52 }
 0x23c   :  { %2992 = vtanh.f32 %v3525_v53 }
 0x23d   :  { %2994 = vrcp.f32 %v662_v54 }
 0x246   :  { %v2993_v55 = vpop.eup %2992 }
 0x247   :  { %v2995_v56 = vpop.eup %2994 }
 0x248   :  { %v669_v57 = vmul.f32 %v2995_v56, %v2993_v55 }
 0x24a   :  { %v670_v58 = vpack.c.bf16 %v669_v57, %v669_v57 }
 0x24c   :  { %1953 = vst [vmem:[%s4204_s2 + $0x4] sm:$0xf] %v670_v58  ;;  %2467 = vmatmul.mubr.bf16.vlgmr.msra.gmra.mrb[16].mxu0 %v670_v58  ;;  %2487 = vmatmul.mubr.bf16.vlgmr.msra.gmra.mrb[16].mxu1 %v670_v58 }
 0x24d   :  { %2491 = vmatpush3.bf16.msra.mxu0 %v3270_v17  ;;  %2511 = vmatpush3.bf16.msra.mxu1 %v3277_v18 }
 0x24e   :  { %2492 = vmatprep.subr.bf16.mxu0 %v3124_v0  ;;  %2512 = vmatprep.subr.bf16.mxu1 %v3124_v0 }
 0x24f   :  { %2506 = vmatprep.mubr.msk.bf16.mxu0 %vm3125_vm0, %v3124_v0  ;;  %2526 = vmatprep.mubr.msk.bf16.mxu1 %vm3125_vm0, %v3124_v0 }
 0x251   :  { %2493 = vmatpush3.bf16.msra.mxu0 %v3284_v20  ;;  %2513 = vmatpush3.bf16.msra.mxu1 %v3291_v21 }
 0x252   :  { %2494 = vmatprep.subr.bf16.mxu0 %v3124_v0  ;;  %2514 = vmatprep.subr.bf16.mxu1 %v3124_v0 }
 0x255   :  { %2495 = vmatpush3.bf16.msra.mxu0 %v3302_v22  ;;  %2515 = vmatpush3.bf16.msra.mxu1 %v3309_v23 }
 0x256   :  { %2496 = vmatprep.subr.bf16.mxu0 %v3124_v0  ;;  %2516 = vmatprep.subr.bf16.mxu1 %v3124_v0 }
 0x259   :  { %2497 = vmatpush3.bf16.msra.mxu0 %v3316_v24  ;;  %2517 = vmatpush3.bf16.msra.mxu1 %v3323_v25 }
 0x25a   :  { %2498 = vmatprep.subr.bf16.mxu0 %v3124_v0  ;;  %2518 = vmatprep.subr.bf16.mxu1 %v3124_v0 }
 0x25d   :  { %2499 = vmatpush3.bf16.msra.mxu0 %v3330_v26  ;;  %2519 = vmatpush3.bf16.msra.mxu1 %v3337_v27 }
 0x25e   :  { %2500 = vmatprep.subr.bf16.mxu0 %v3124_v0  ;;  %2520 = vmatprep.subr.bf16.mxu1 %v3124_v0 }
 0x261   :  { %2501 = vmatpush3.bf16.msra.mxu0 %v3344_v28  ;;  %2521 = vmatpush3.bf16.msra.mxu1 %v3351_v29 }
 0x262   :  { %2502 = vmatprep.subr.bf16.mxu0 %v3124_v0  ;;  %2522 = vmatprep.subr.bf16.mxu1 %v3124_v0 }
 0x265   :  { %2503 = vmatpush3.bf16.msra.mxu0 %v3358_v30  ;;  %2523 = vmatpush3.bf16.msra.mxu1 %v3365_v31 }
 0x266   :  { %2504 = vmatprep.subr.bf16.mxu0 %v3124_v0  ;;  %2524 = vmatprep.subr.bf16.mxu1 %v3124_v0 }
 0x269   :  { %2505 = vmatpush3.bf16.msra.mxu0 %v3372_v32  ;;  %2525 = vmatpush3.bf16.msra.mxu1 %v3379_v33 }
 0x26a   :  { %2530 = vmatprep.subr.bf16.mxu0 %v3124_v0  ;;  %2550 = vmatprep.subr.bf16.mxu1 %v3124_v0 }
 0x26c   :  { %2507 = vmatmul.mubr.bf16.vlgmr.msra.gmra.mrb[20].mxu0 %v670_v58  ;;  %2527 = vmatmul.mubr.bf16.vlgmr.msra.gmra.mrb[20].mxu1 %v670_v58 }
 0x26d   :  { %2531 = vmatpush3.bf16.msra.mxu0 %v3157_v1  ;;  %2551 = vmatpush3.bf16.msra.mxu1 %v3162_v2 }
 0x26e   :  { %2532 = vmatprep.subr.bf16.mxu0 %v3124_v0  ;;  %2552 = vmatprep.subr.bf16.mxu1 %v3124_v0 }
 0x26f   :  { %2546 = vmatprep.mubr.msk.bf16.mxu0 %vm3125_vm0, %v3124_v0  ;;  %2566 = vmatprep.mubr.msk.bf16.mxu1 %vm3125_vm0, %v3124_v0 }
 0x271   :  { %2533 = vmatpush3.bf16.msra.mxu0 %v3172_v3  ;;  %2553 = vmatpush3.bf16.msra.mxu1 %v3179_v4 }
 0x272   :  { %2534 = vmatprep.subr.bf16.mxu0 %v3124_v0  ;;  %2554 = vmatprep.subr.bf16.mxu1 %v3124_v0 }
 0x275   :  { %2535 = vmatpush3.bf16.msra.mxu0 %v3186_v5  ;;  %2555 = vmatpush3.bf16.msra.mxu1 %v3193_v6 }
 0x276   :  { %2536 = vmatprep.subr.bf16.mxu0 %v3124_v0  ;;  %2556 = vmatprep.subr.bf16.mxu1 %v3124_v0 }
 0x279   :  { %2537 = vmatpush3.bf16.msra.mxu0 %v3200_v7  ;;  %2557 = vmatpush3.bf16.msra.mxu1 %v3207_v8 }
 0x27a   :  { %2538 = vmatprep.subr.bf16.mxu0 %v3124_v0  ;;  %2558 = vmatprep.subr.bf16.mxu1 %v3124_v0 }
 0x27d   :  { %2539 = vmatpush3.bf16.msra.mxu0 %v3214_v9  ;;  %2559 = vmatpush3.bf16.msra.mxu1 %v3221_v10 }
 0x27e   :  { %2540 = vmatprep.subr.bf16.mxu0 %v3124_v0  ;;  %2560 = vmatprep.subr.bf16.mxu1 %v3124_v0 }
 0x281   :  { %2541 = vmatpush3.bf16.msra.mxu0 %v3228_v11  ;;  %2561 = vmatpush3.bf16.msra.mxu1 %v3235_v12 }
 0x282   :  { %2542 = vmatprep.subr.bf16.mxu0 %v3124_v0  ;;  %2562 = vmatprep.subr.bf16.mxu1 %v3124_v0 }
 0x285   :  { %2543 = vmatpush3.bf16.msra.mxu0 %v3242_v13  ;;  %2563 = vmatpush3.bf16.msra.mxu1 %v3249_v14 }
 0x286   :  { %2544 = vmatprep.subr.bf16.mxu0 %v3124_v0  ;;  %2564 = vmatprep.subr.bf16.mxu1 %v3124_v0 }
 0x289   :  { %2545 = vmatpush3.bf16.msra.mxu0 %v3256_v15  ;;  %2565 = vmatpush3.bf16.msra.mxu1 %v3263_v16 }
 0x28a   :  { %2570 = vmatprep.subr.bf16.mxu0 %v3124_v0  ;;  %2590 = vmatprep.subr.bf16.mxu1 %v3124_v0 }
 0x31f   :  { %v712_v1 = vpop.f32.mrb[16].mxu0  ;;  %v753_v2 = vpop.f32.mrb[16].mxu1 }
 0x320   :  { %v2468_v3 = vpop.f32.mrb[17].mxu0  ;;  %v2488_v4 = vpop.f32.mrb[17].mxu1  ;;  %v759_v60 = vadd.f32 %v1955_v40, %v753_v2  ;;  %v718_v61 = vadd.f32 %v1954_v59, %v712_v1  ;;  %v1963_v59 = vld [vmem:[%s4203_s0 + $0x68] sm:$0xff] }
 0x321   :  { %v715_v5 = vpop.f32.mrb[18].mxu0  ;;  %v756_v6 = vpop.f32.mrb[18].mxu1 }
 0x322   :  { %v2469_v7 = vpop.f32.mrb[19].mxu0  ;;  %v2489_v8 = vpop.f32.mrb[19].mxu1  ;;  %v1959_v62 = vmul.f32 -1.442695, %v759_v60  ;;  %v1958_v63 = vmul.f32 -1.442695, %v718_v61 }
 0x323   :  { %v3707_v6 = vld [vmem:[%s4202_s1 + $0x18] sm:$0xff]  }
 0x324   :  { %2996 = vpow2.f32 %v1959_v62  ;;  %v3713_v7 = vld [vmem:[%s4202_s1 + $0x58] sm:$0xff]  }
 0x325   :  { %2998 = vpow2.f32 %v1958_v63 }
 0x32e   :  { %v2997_v19 = vpop.eup %2996 }
 0x32f   :  { %v2999_v34 = vpop.eup %2998  ;;  %v851_v35 = vadd.f32 1.0, %v2997_v19 }
 0x330   :  { %v845_v36 = vadd.f32 1.0, %v2999_v34 }
 0x331   :  { %3000 = vrcp.f32 %v851_v35 }
 0x332   :  { %3002 = vrcp.f32 %v845_v36  ;;  %v1964_v36 = vld [vmem:[%s4203_s0 + $0x70] sm:$0xff] }
 0x33b   :  { %v3001_v51 = vpop.eup %3000 }
 0x33c   :  { %v3003_v52 = vpop.eup %3002  ;;  %v861_v55 = vmul.f32 %v3001_v51, %v3525_v53  ;;  %v3699_v53 = vld [vmem:[%s4202_s1 + $0x50] sm:$0xff]  }
 0x33f   :  { %v794_v39 = vpop.f32.mrb[20].mxu0  ;;  %v835_v41 = vpop.f32.mrb[20].mxu1 }
 0x340   :  { %v800_v42 = vadd.f32 %v1956_v37, %v794_v39  ;;  %v841_v43 = vadd.f32 %v1957_v38, %v835_v41  ;;  %v2508_v44 = vpop.f32.mrb[21].mxu0  ;;  %v2528_v45 = vpop.f32.mrb[21].mxu1  ;;  %v1965_v37 = vld [vmem:[%s4203_s0 + $0x78] sm:$0xff] }
 0x341   :  { %v797_v46 = vpop.f32.mrb[22].mxu0  ;;  %v838_v47 = vpop.f32.mrb[22].mxu1 }
 0x342   :  { %3004 = vtanh.f32 %v800_v42  ;;  %v1960_v48 = vmul.f32 -1.442695, %v841_v43  ;;  %v2509_v49 = vpop.f32.mrb[23].mxu0  ;;  %v2529_v50 = vpop.f32.mrb[23].mxu1 }
 0x344   :  { %3006 = vpow2.f32 %v1960_v48 }
 0x34c   :  { %v3005_v54 = vpop.eup %3004 }
 0x34d   :  { %v862_v56 = vmul.f32 %v3005_v54, %v3003_v52 }
 0x34e   :  { %v3007_v57 = vpop.eup %3006 }
 0x34f   :  { %v3616_v58 = vadd.f32 %v862_v56, %v861_v55  ;;  %v858_v1 = vadd.f32 1.0, %v3007_v57 }
 0x351   :  { %3008 = vtanh.f32 %v3616_v58 }
 0x352   :  { %3010 = vrcp.f32 %v858_v1 }
 0x35b   :  { %v3009_v2 = vpop.eup %3008 }
 0x35c   :  { %v3011_v3 = vpop.eup %3010 }
 0x35d   :  { %v865_v4 = vmul.f32 %v3011_v3, %v3009_v2 }
 0x35f   :  { %v866_v5 = vpack.c.bf16 %v865_v4, %v865_v4 }
 0x361   :  { %1961 = vst [vmem:[%s4204_s2 + $0x8] sm:$0xf] %v866_v5  ;;  %2547 = vmatmul.mubr.bf16.vlgmr.msra.gmra.mrb[24].mxu0 %v866_v5  ;;  %2567 = vmatmul.mubr.bf16.vlgmr.msra.gmra.mrb[24].mxu1 %v866_v5 }
 0x362   :  { %2571 = vmatpush3.bf16.msra.mxu0 %v3270_v17  ;;  %2591 = vmatpush3.bf16.msra.mxu1 %v3277_v18  ;;  %v3661_v17 = vld [vmem:[%s4202_s1] sm:$0xff]  }
 0x363   :  { %2572 = vmatprep.subr.bf16.mxu0 %v3124_v0  ;;  %2592 = vmatprep.subr.bf16.mxu1 %v3124_v0  ;;  %v3667_v18 = vld [vmem:[%s4202_s1 + $0x40] sm:$0xff]  }
 0x364   :  { %2586 = vmatprep.mubr.msk.bf16.mxu0 %vm3125_vm0, %v3124_v0  ;;  %2606 = vmatprep.mubr.msk.bf16.mxu1 %vm3125_vm0, %v3124_v0 }
 0x366   :  { %2573 = vmatpush3.bf16.msra.mxu0 %v3284_v20  ;;  %2593 = vmatpush3.bf16.msra.mxu1 %v3291_v21  ;;  %v3679_v20 = vld [vmem:[%s4202_s1 + $0x8] sm:$0xff]  }
 0x367   :  { %2574 = vmatprep.subr.bf16.mxu0 %v3124_v0  ;;  %2594 = vmatprep.subr.bf16.mxu1 %v3124_v0  ;;  %v3685_v21 = vld [vmem:[%s4202_s1 + $0x48] sm:$0xff]  }
 0x36a   :  { %2575 = vmatpush3.bf16.msra.mxu0 %v3302_v22  ;;  %2595 = vmatpush3.bf16.msra.mxu1 %v3309_v23  ;;  %v3693_v22 = vld [vmem:[%s4202_s1 + $0x10] sm:$0xff]  }
 0x36b   :  { %2576 = vmatprep.subr.bf16.mxu0 %v3124_v0  ;;  %2596 = vmatprep.subr.bf16.mxu1 %v3124_v0 }
 0x36e   :  { %2577 = vmatpush3.bf16.msra.mxu0 %v3316_v24  ;;  %2597 = vmatpush3.bf16.msra.mxu1 %v3323_v25 }
 0x36f   :  { %2578 = vmatprep.subr.bf16.mxu0 %v3124_v0  ;;  %2598 = vmatprep.subr.bf16.mxu1 %v3124_v0 }
 0x372   :  { %2579 = vmatpush3.bf16.msra.mxu0 %v3330_v26  ;;  %2599 = vmatpush3.bf16.msra.mxu1 %v3337_v27 }
 0x373   :  { %2580 = vmatprep.subr.bf16.mxu0 %v3124_v0  ;;  %2600 = vmatprep.subr.bf16.mxu1 %v3124_v0 }
 0x376   :  { %2581 = vmatpush3.bf16.msra.mxu0 %v3344_v28  ;;  %2601 = vmatpush3.bf16.msra.mxu1 %v3351_v29 }
 0x377   :  { %2582 = vmatprep.subr.bf16.mxu0 %v3124_v0  ;;  %2602 = vmatprep.subr.bf16.mxu1 %v3124_v0 }
 0x37a   :  { %2583 = vmatpush3.bf16.msra.mxu0 %v3358_v30  ;;  %2603 = vmatpush3.bf16.msra.mxu1 %v3365_v31 }
 0x37b   :  { %2584 = vmatprep.subr.bf16.mxu0 %v3124_v0  ;;  %2604 = vmatprep.subr.bf16.mxu1 %v3124_v0 }
 0x37e   :  { %2585 = vmatpush3.bf16.msra.mxu0 %v3372_v32  ;;  %2605 = vmatpush3.bf16.msra.mxu1 %v3379_v33 }
 0x37f   :  { %2610 = vmatprep.subr.bf16.mxu0 %v3124_v0  ;;  %2630 = vmatprep.subr.bf16.mxu1 %v3124_v0 }
 0x381   :  { %2587 = vmatmul.mubr.bf16.vlgmr.msra.gmra.mrb[28].mxu0 %v866_v5  ;;  %2607 = vmatmul.mubr.bf16.vlgmr.msra.gmra.mrb[28].mxu1 %v866_v5 }
 0x382   :  { %2611 = vmatpush3.bf16.msra.mxu0 %v3661_v17  ;;  %2631 = vmatpush3.bf16.msra.mxu1 %v3667_v18 }
 0x383   :  { %2612 = vmatprep.subr.bf16.mxu0 %v3124_v0  ;;  %2632 = vmatprep.subr.bf16.mxu1 %v3124_v0 }
 0x384   :  { %2626 = vmatprep.mubr.msk.bf16.mxu0 %vm3125_vm0, %v3124_v0  ;;  %2646 = vmatprep.mubr.msk.bf16.mxu1 %vm3125_vm0, %v3124_v0 }
 0x386   :  { %2613 = vmatpush3.bf16.msra.mxu0 %v3679_v20  ;;  %2633 = vmatpush3.bf16.msra.mxu1 %v3685_v21 }
 0x387   :  { %2614 = vmatprep.subr.bf16.mxu0 %v3124_v0  ;;  %2634 = vmatprep.subr.bf16.mxu1 %v3124_v0 }
 0x38a   :  { %2615 = vmatpush3.bf16.msra.mxu0 %v3693_v22  ;;  %2635 = vmatpush3.bf16.msra.mxu1 %v3699_v53 }
 0x38b   :  { %2616 = vmatprep.subr.bf16.mxu0 %v3124_v0  ;;  %2636 = vmatprep.subr.bf16.mxu1 %v3124_v0 }
 0x38e   :  { %2617 = vmatpush3.bf16.msra.mxu0 %v3707_v6  ;;  %2637 = vmatpush3.bf16.msra.mxu1 %v3713_v7 }
 0x38f   :  { %2618 = vmatprep.subr.bf16.mxu0 %v3124_v0  ;;  %2638 = vmatprep.subr.bf16.mxu1 %v3124_v0 }
 0x392   :  { %2619 = vmatpush3.bf16.msra.mxu0 %v3214_v9  ;;  %2639 = vmatpush3.bf16.msra.mxu1 %v3221_v10 }
 0x393   :  { %2620 = vmatprep.subr.bf16.mxu0 %v3124_v0  ;;  %2640 = vmatprep.subr.bf16.mxu1 %v3124_v0 }
 0x396   :  { %2621 = vmatpush3.bf16.msra.mxu0 %v3228_v11  ;;  %2641 = vmatpush3.bf16.msra.mxu1 %v3235_v12 }
 0x397   :  { %2622 = vmatprep.subr.bf16.mxu0 %v3124_v0  ;;  %2642 = vmatprep.subr.bf16.mxu1 %v3124_v0 }
 0x39a   :  { %2623 = vmatpush3.bf16.msra.mxu0 %v3242_v13  ;;  %2643 = vmatpush3.bf16.msra.mxu1 %v3249_v14 }
 0x39b   :  { %2624 = vmatprep.subr.bf16.mxu0 %v3124_v0  ;;  %2644 = vmatprep.subr.bf16.mxu1 %v3124_v0 }
 0x39e   :  { %2625 = vmatpush3.bf16.msra.mxu0 %v3256_v15  ;;  %2645 = vmatpush3.bf16.msra.mxu1 %v3263_v16  ;;  %v1962_v15 = vld [vmem:[%s4203_s0 + $0x60] sm:$0xff] }
 0x39f   :  { %2650 = vmatprep.subr.bf16.mxu0 %v3124_v0  ;;  %2670 = vmatprep.subr.bf16.mxu1 %v3124_v0 }
 0x434   :  { %v908_v9 = vpop.f32.mrb[24].mxu0  ;;  %v949_v10 = vpop.f32.mrb[24].mxu1 }
 0x435   :  { %v2548_v11 = vpop.f32.mrb[25].mxu0  ;;  %v2568_v12 = vpop.f32.mrb[25].mxu1  ;;  %v955_v16 = vadd.f32 %v1963_v59, %v949_v10  ;;  %v914_v60 = vadd.f32 %v1962_v15, %v908_v9  ;;  %v3762_v9 = vld [vmem:[%s4202_s1 + $0xc0] sm:$0xff]   ;;  %v3774_v10 = vld [vmem:[%s4202_s1 + $0x88] sm:$0xff]  }
 0x436   :  { %v911_v8 = vpop.f32.mrb[26].mxu0  ;;  %v952_v13 = vpop.f32.mrb[26].mxu1  ;;  %v3780_v11 = vld [vmem:[%s4202_s1 + $0xc8] sm:$0xff]   ;;  %v3788_v12 = vld [vmem:[%s4202_s1 + $0x90] sm:$0xff]  }
 0x437   :  { %v2549_v40 = vpop.f32.mrb[27].mxu0  ;;  %v2569_v14 = vpop.f32.mrb[27].mxu1  ;;  %v1967_v61 = vmul.f32 -1.442695, %v955_v16  ;;  %v1966_v62 = vmul.f32 -1.442695, %v914_v60 }
 0x438   :  { %v1971_v15 = vld [vmem:[%s4203_s0 + $0x88] sm:$0xff]  ;;  %v1970_v16 = vld [vmem:[%s4203_s0 + $0x80] sm:$0xff] }
 0x439   :  { %3012 = vpow2.f32 %v1967_v61 }
 0x43a   :  { %3014 = vpow2.f32 %v1966_v62 }
 0x443   :  { %v3013_v63 = vpop.eup %3012 }
 0x444   :  { %v3015_v19 = vpop.eup %3014  ;;  %v1047_v34 = vadd.f32 1.0, %v3013_v63 }
 0x445   :  { %v1041_v35 = vadd.f32 1.0, %v3015_v19 }
 0x446   :  { %3016 = vrcp.f32 %v1047_v34 }
 0x447   :  { %3018 = vrcp.f32 %v1041_v35 }
 0x450   :  { %v3017_v50 = vpop.eup %3016 }
 0x451   :  { %v3019_v51 = vpop.eup %3018  ;;  %v1057_v54 = vmul.f32 %v3017_v50, %v3616_v58  ;;  %v3756_v58 = vld [vmem:[%s4202_s1 + $0x80] sm:$0xff]  }
 0x454   :  { %v990_v38 = vpop.f32.mrb[28].mxu0  ;;  %v1031_v39 = vpop.f32.mrb[28].mxu1 }
 0x455   :  { %v996_v41 = vadd.f32 %v1964_v36, %v990_v38  ;;  %v1037_v42 = vadd.f32 %v1965_v37, %v1031_v39  ;;  %v2588_v43 = vpop.f32.mrb[29].mxu0  ;;  %v2608_v44 = vpop.f32.mrb[29].mxu1  ;;  %v1972_v37 = vld [vmem:[%s4203_s0 + $0x90] sm:$0xff]  ;;  %v1973_v38 = vld [vmem:[%s4203_s0 + $0x98] sm:$0xff] }
 0x456   :  { %v993_v45 = vpop.f32.mrb[30].mxu0  ;;  %v1034_v46 = vpop.f32.mrb[30].mxu1 }
 0x457   :  { %3020 = vtanh.f32 %v996_v41  ;;  %v1968_v47 = vmul.f32 -1.442695, %v1037_v42  ;;  %v2589_v48 = vpop.f32.mrb[31].mxu0  ;;  %v2609_v49 = vpop.f32.mrb[31].mxu1 }
 0x459   :  { %3022 = vpow2.f32 %v1968_v47 }
 0x461   :  { %v3021_v52 = vpop.eup %3020 }
 0x462   :  { %v1058_v55 = vmul.f32 %v3021_v52, %v3019_v51 }
 0x463   :  { %v3023_v56 = vpop.eup %3022 }
 0x464   :  { %v3747_v57 = vadd.f32 %v1058_v55, %v1057_v54  ;;  %v1054_v1 = vadd.f32 1.0, %v3023_v56 }
 0x466   :  { %3024 = vtanh.f32 %v3747_v57 }
 0x467   :  { %3026 = vrcp.f32 %v1054_v1 }
 0x470   :  { %v3025_v2 = vpop.eup %3024 }
 0x471   :  { %v3027_v3 = vpop.eup %3026 }
 0x472   :  { %v1061_v4 = vmul.f32 %v3027_v3, %v3025_v2 }
 0x474   :  { %v1062_v5 = vpack.c.bf16 %v1061_v4, %v1061_v4 }
 0x476   :  { %1969 = vst [vmem:[%s4204_s2 + $0xc] sm:$0xf] %v1062_v5  ;;  %2627 = vmatmul.mubr.bf16.vlgmr.msra.gmra.mrb[32].mxu0 %v1062_v5  ;;  %2647 = vmatmul.mubr.bf16.vlgmr.msra.gmra.mrb[32].mxu1 %v1062_v5 }
 0x477   :  { %2651 = vmatpush3.bf16.msra.mxu0 %v3756_v58  ;;  %2671 = vmatpush3.bf16.msra.mxu1 %v3762_v9 }
 0x478   :  { %2652 = vmatprep.subr.bf16.mxu0 %v3124_v0  ;;  %2672 = vmatprep.subr.bf16.mxu1 %v3124_v0 }
 0x479   :  { %2666 = vmatprep.mubr.msk.bf16.mxu0 %vm3125_vm0, %v3124_v0  ;;  %2686 = vmatprep.mubr.msk.bf16.mxu1 %vm3125_vm0, %v3124_v0 }
 0x47b   :  { %2653 = vmatpush3.bf16.msra.mxu0 %v3774_v10  ;;  %2673 = vmatpush3.bf16.msra.mxu1 %v3780_v11 }
 0x47c   :  { %2654 = vmatprep.subr.bf16.mxu0 %v3124_v0  ;;  %2674 = vmatprep.subr.bf16.mxu1 %v3124_v0 }
 0x47f   :  { %2655 = vmatpush3.bf16.msra.mxu0 %v3788_v12  ;;  %2675 = vmatpush3.bf16.msra.mxu1 %v3309_v23  ;;  %v3837_v23 = vld [vmem:[%s4202_s1 + $0x20] sm:$0xff]  }
 0x480   :  { %2656 = vmatprep.subr.bf16.mxu0 %v3124_v0  ;;  %2676 = vmatprep.subr.bf16.mxu1 %v3124_v0 }
 0x483   :  { %2657 = vmatpush3.bf16.msra.mxu0 %v3316_v24  ;;  %2677 = vmatpush3.bf16.msra.mxu1 %v3323_v25  ;;  %v3843_v24 = vld [vmem:[%s4202_s1 + $0x60] sm:$0xff]   ;;  %v3851_v25 = vld [vmem:[%s4202_s1 + $0x28] sm:$0xff]  }
 0x484   :  { %2658 = vmatprep.subr.bf16.mxu0 %v3124_v0  ;;  %2678 = vmatprep.subr.bf16.mxu1 %v3124_v0 }
 0x487   :  { %2659 = vmatpush3.bf16.msra.mxu0 %v3330_v26  ;;  %2679 = vmatpush3.bf16.msra.mxu1 %v3337_v27  ;;  %v3857_v26 = vld [vmem:[%s4202_s1 + $0x68] sm:$0xff]   ;;  %v3865_v27 = vld [vmem:[%s4202_s1 + $0x30] sm:$0xff]  }
 0x488   :  { %2660 = vmatprep.subr.bf16.mxu0 %v3124_v0  ;;  %2680 = vmatprep.subr.bf16.mxu1 %v3124_v0 }
 0x48b   :  { %2661 = vmatpush3.bf16.msra.mxu0 %v3344_v28  ;;  %2681 = vmatpush3.bf16.msra.mxu1 %v3351_v29  ;;  %v3871_v28 = vld [vmem:[%s4202_s1 + $0x70] sm:$0xff]   ;;  %v3879_v29 = vld [vmem:[%s4202_s1 + $0x38] sm:$0xff]  }
 0x48c   :  { %2662 = vmatprep.subr.bf16.mxu0 %v3124_v0  ;;  %2682 = vmatprep.subr.bf16.mxu1 %v3124_v0 }
 0x48f   :  { %2663 = vmatpush3.bf16.msra.mxu0 %v3358_v30  ;;  %2683 = vmatpush3.bf16.msra.mxu1 %v3365_v31  ;;  %v3885_v30 = vld [vmem:[%s4202_s1 + $0x78] sm:$0xff]  }
 0x490   :  { %2664 = vmatprep.subr.bf16.mxu0 %v3124_v0  ;;  %2684 = vmatprep.subr.bf16.mxu1 %v3124_v0 }
 0x493   :  { %2665 = vmatpush3.bf16.msra.mxu0 %v3372_v32  ;;  %2685 = vmatpush3.bf16.msra.mxu1 %v3379_v33 }
 0x494   :  { %2690 = vmatprep.subr.bf16.mxu0 %v3124_v0  ;;  %2710 = vmatprep.subr.bf16.mxu1 %v3124_v0 }
 0x496   :  { %2667 = vmatmul.mubr.bf16.vlgmr.msra.gmra.mrb[36].mxu0 %v1062_v5  ;;  %2687 = vmatmul.mubr.bf16.vlgmr.msra.gmra.mrb[36].mxu1 %v1062_v5 }
 0x497   :  { %2691 = vmatpush3.bf16.msra.mxu0 %v3661_v17  ;;  %2711 = vmatpush3.bf16.msra.mxu1 %v3667_v18 }
 0x498   :  { %2692 = vmatprep.subr.bf16.mxu0 %v3124_v0  ;;  %2712 = vmatprep.subr.bf16.mxu1 %v3124_v0 }
 0x499   :  { %2706 = vmatprep.mubr.msk.bf16.mxu0 %vm3125_vm0, %v3124_v0  ;;  %2726 = vmatprep.mubr.msk.bf16.mxu1 %vm3125_vm0, %v3124_v0 }
 0x49b   :  { %2693 = vmatpush3.bf16.msra.mxu0 %v3679_v20  ;;  %2713 = vmatpush3.bf16.msra.mxu1 %v3685_v21 }
 0x49c   :  { %2694 = vmatprep.subr.bf16.mxu0 %v3124_v0  ;;  %2714 = vmatprep.subr.bf16.mxu1 %v3124_v0 }
 0x49f   :  { %2695 = vmatpush3.bf16.msra.mxu0 %v3693_v22  ;;  %2715 = vmatpush3.bf16.msra.mxu1 %v3699_v53 }
 0x4a0   :  { %2696 = vmatprep.subr.bf16.mxu0 %v3124_v0  ;;  %2716 = vmatprep.subr.bf16.mxu1 %v3124_v0 }
 0x4a3   :  { %2697 = vmatpush3.bf16.msra.mxu0 %v3707_v6  ;;  %2717 = vmatpush3.bf16.msra.mxu1 %v3713_v7 }
 0x4a4   :  { %2698 = vmatprep.subr.bf16.mxu0 %v3124_v0  ;;  %2718 = vmatprep.subr.bf16.mxu1 %v3124_v0 }
 0x4a7   :  { %2699 = vmatpush3.bf16.msra.mxu0 %v3837_v23  ;;  %2719 = vmatpush3.bf16.msra.mxu1 %v3843_v24 }
 0x4a8   :  { %2700 = vmatprep.subr.bf16.mxu0 %v3124_v0  ;;  %2720 = vmatprep.subr.bf16.mxu1 %v3124_v0 }
 0x4ab   :  { %2701 = vmatpush3.bf16.msra.mxu0 %v3851_v25  ;;  %2721 = vmatpush3.bf16.msra.mxu1 %v3857_v26 }
 0x4ac   :  { %2702 = vmatprep.subr.bf16.mxu0 %v3124_v0  ;;  %2722 = vmatprep.subr.bf16.mxu1 %v3124_v0 }
 0x4af   :  { %2703 = vmatpush3.bf16.msra.mxu0 %v3865_v27  ;;  %2723 = vmatpush3.bf16.msra.mxu1 %v3871_v28 }
 0x4b0   :  { %2704 = vmatprep.subr.bf16.mxu0 %v3124_v0  ;;  %2724 = vmatprep.subr.bf16.mxu1 %v3124_v0 }
 0x4b3   :  { %2705 = vmatpush3.bf16.msra.mxu0 %v3879_v29  ;;  %2725 = vmatpush3.bf16.msra.mxu1 %v3885_v30 }
 0x4b4   :  { %2730 = vmatprep.subr.bf16.mxu0 %v3124_v0  ;;  %2750 = vmatprep.subr.bf16.mxu1 %v3124_v0 }
 0x549   :  { %v1104_v31 = vpop.f32.mrb[32].mxu0  ;;  %v1145_v32 = vpop.f32.mrb[32].mxu1 }
 0x54a   :  { %v2628_v33 = vpop.f32.mrb[33].mxu0  ;;  %v2648_v8 = vpop.f32.mrb[33].mxu1  ;;  %v1151_v60 = vadd.f32 %v1971_v15, %v1145_v32  ;;  %v1110_v61 = vadd.f32 %v1970_v16, %v1104_v31  ;;  %v3975_v15 = vld [vmem:[%s4202_s1 + $0xb0] sm:$0xff]  }
 0x54b   :  { %v1107_v13 = vpop.f32.mrb[34].mxu0  ;;  %v1148_v40 = vpop.f32.mrb[34].mxu1  ;;  %v3933_v33 = vld [vmem:[%s4202_s1 + $0x98] sm:$0xff]   ;;  %v3981_v16 = vld [vmem:[%s4202_s1 + $0xf0] sm:$0xff]  }
 0x54c   :  { %v2629_v14 = vpop.f32.mrb[35].mxu0  ;;  %v2649_v59 = vpop.f32.mrb[35].mxu1  ;;  %v1975_v62 = vmul.f32 -1.442695, %v1151_v60  ;;  %v1974_v63 = vmul.f32 -1.442695, %v1110_v61 }
 0x54d   :  { %v3939_v8 = vld [vmem:[%s4202_s1 + $0xd8] sm:$0xff]   ;;  %v3947_v13 = vld [vmem:[%s4202_s1 + $0xa0] sm:$0xff]   ;;  %v3961_v14 = vld [vmem:[%s4202_s1 + $0xa8] sm:$0xff]  }
 0x54e   :  { %3028 = vpow2.f32 %v1975_v62  ;;  %v3953_v40 = vld [vmem:[%s4202_s1 + $0xe0] sm:$0xff]   ;;  %v3967_v59 = vld [vmem:[%s4202_s1 + $0xe8] sm:$0xff]   ;;  %v3989_v60 = vld [vmem:[%s4202_s1 + $0xb8] sm:$0xff]  }
 0x54f   :  { %3030 = vpow2.f32 %v1974_v63  ;;  %v3995_v61 = vld [vmem:[%s4202_s1 + $0xf8] sm:$0xff]  }
 0x558   :  { %v3029_v19 = vpop.eup %3028 }
 0x559   :  { %v3031_v34 = vpop.eup %3030  ;;  %v1243_v35 = vadd.f32 1.0, %v3029_v19 }
 0x55a   :  { %v1237_v36 = vadd.f32 1.0, %v3031_v34 }
 0x55b   :  { %3032 = vrcp.f32 %v1243_v35 }
 0x55c   :  { %3034 = vrcp.f32 %v1237_v36 }
 0x565   :  { %v3033_v51 = vpop.eup %3032 }
 0x566   :  { %v3035_v52 = vpop.eup %3034  ;;  %v1253_v55 = vmul.f32 %v3033_v51, %v3747_v57  ;;  %v3925_v57 = vld [vmem:[%s4202_s1 + $0xd0] sm:$0xff]   ;;  %v1981_v51 = vld [vmem:[%s4203_s0 + $0xb8] sm:$0xff] }
 0x569   :  { %v1186_v39 = vpop.f32.mrb[36].mxu0  ;;  %v1227_v41 = vpop.f32.mrb[36].mxu1 }
 0x56a   :  { %v1192_v42 = vadd.f32 %v1972_v37, %v1186_v39  ;;  %v1233_v43 = vadd.f32 %v1973_v38, %v1227_v41  ;;  %v2668_v44 = vpop.f32.mrb[37].mxu0  ;;  %v2688_v45 = vpop.f32.mrb[37].mxu1  ;;  %v1979_v39 = vld [vmem:[%s4203_s0 + $0xa8] sm:$0xff]  ;;  %v1978_v41 = vld [vmem:[%s4203_s0 + $0xa0] sm:$0xff] }
 0x56b   :  { %v1189_v46 = vpop.f32.mrb[38].mxu0  ;;  %v1230_v47 = vpop.f32.mrb[38].mxu1 }
 0x56c   :  { %3036 = vtanh.f32 %v1192_v42  ;;  %v1976_v48 = vmul.f32 -1.442695, %v1233_v43  ;;  %v2669_v49 = vpop.f32.mrb[39].mxu0  ;;  %v2689_v50 = vpop.f32.mrb[39].mxu1 }
 0x56d   :  { %v1980_v50 = vld [vmem:[%s4203_s0 + $0xb0] sm:$0xff] }
 0x56e   :  { %3038 = vpow2.f32 %v1976_v48 }
 0x576   :  { %v3037_v54 = vpop.eup %3036 }
 0x577   :  { %v1254_v56 = vmul.f32 %v3037_v54, %v3035_v52 }
 0x578   :  { %v3039_v1 = vpop.eup %3038 }
 0x579   :  { %v3903_v2 = vadd.f32 %v1254_v56, %v1253_v55  ;;  %v1250_v3 = vadd.f32 1.0, %v3039_v1 }
 0x57b   :  { %3040 = vtanh.f32 %v3903_v2 }
 0x57c   :  { %3042 = vrcp.f32 %v1250_v3 }
 0x585   :  { %v3041_v4 = vpop.eup %3040 }
 0x586   :  { %v3043_v5 = vpop.eup %3042 }
 0x587   :  { %v1257_v31 = vmul.f32 %v3043_v5, %v3041_v4 }
 0x589   :  { %v1258_v32 = vpack.c.bf16 %v1257_v31, %v1257_v31 }
 0x58b   :  { %1977 = vst [vmem:[%s4204_s2 + $0x10] sm:$0xf] %v1258_v32  ;;  %2707 = vmatmul.mubr.bf16.vlgmr.msra.gmra.mrb[40].mxu0 %v1258_v32  ;;  %2727 = vmatmul.mubr.bf16.vlgmr.msra.gmra.mrb[40].mxu1 %v1258_v32 }
 0x58c   :  { %2731 = vmatpush3.bf16.msra.mxu0 %v3756_v58  ;;  %2751 = vmatpush3.bf16.msra.mxu1 %v3762_v9 }
 0x58d   :  { %2732 = vmatprep.subr.bf16.mxu0 %v3124_v0  ;;  %2752 = vmatprep.subr.bf16.mxu1 %v3124_v0 }
 0x58e   :  { %2746 = vmatprep.mubr.msk.bf16.mxu0 %vm3125_vm0, %v3124_v0  ;;  %2766 = vmatprep.mubr.msk.bf16.mxu1 %vm3125_vm0, %v3124_v0 }
 0x590   :  { %2733 = vmatpush3.bf16.msra.mxu0 %v3774_v10  ;;  %2753 = vmatpush3.bf16.msra.mxu1 %v3780_v11 }
 0x591   :  { %2734 = vmatprep.subr.bf16.mxu0 %v3124_v0  ;;  %2754 = vmatprep.subr.bf16.mxu1 %v3124_v0 }
 0x594   :  { %2735 = vmatpush3.bf16.msra.mxu0 %v3788_v12  ;;  %2755 = vmatpush3.bf16.msra.mxu1 %v3925_v57 }
 0x595   :  { %2736 = vmatprep.subr.bf16.mxu0 %v3124_v0  ;;  %2756 = vmatprep.subr.bf16.mxu1 %v3124_v0 }
 0x598   :  { %2737 = vmatpush3.bf16.msra.mxu0 %v3933_v33  ;;  %2757 = vmatpush3.bf16.msra.mxu1 %v3939_v8 }
 0x599   :  { %2738 = vmatprep.subr.bf16.mxu0 %v3124_v0  ;;  %2758 = vmatprep.subr.bf16.mxu1 %v3124_v0 }
 0x59c   :  { %2739 = vmatpush3.bf16.msra.mxu0 %v3947_v13  ;;  %2759 = vmatpush3.bf16.msra.mxu1 %v3953_v40 }
 0x59d   :  { %2740 = vmatprep.subr.bf16.mxu0 %v3124_v0  ;;  %2760 = vmatprep.subr.bf16.mxu1 %v3124_v0 }
 0x5a0   :  { %2741 = vmatpush3.bf16.msra.mxu0 %v3961_v14  ;;  %2761 = vmatpush3.bf16.msra.mxu1 %v3967_v59 }
 0x5a1   :  { %2742 = vmatprep.subr.bf16.mxu0 %v3124_v0  ;;  %2762 = vmatprep.subr.bf16.mxu1 %v3124_v0 }
 0x5a4   :  { %2743 = vmatpush3.bf16.msra.mxu0 %v3975_v15  ;;  %2763 = vmatpush3.bf16.msra.mxu1 %v3981_v16 }
 0x5a5   :  { %2744 = vmatprep.subr.bf16.mxu0 %v3124_v0  ;;  %2764 = vmatprep.subr.bf16.mxu1 %v3124_v0 }
 0x5a8   :  { %2745 = vmatpush3.bf16.msra.mxu0 %v3989_v60  ;;  %2765 = vmatpush3.bf16.msra.mxu1 %v3995_v61 }
 0x5a9   :  { %2770 = vmatprep.subr.bf16.mxu0 %v3124_v0  ;;  %2790 = vmatprep.subr.bf16.mxu1 %v3124_v0 }
 0x5ab   :  { %2747 = vmatmul.mubr.bf16.vlgmr.msra.gmra.mrb[44].mxu0 %v1258_v32  ;;  %2767 = vmatmul.mubr.bf16.vlgmr.msra.gmra.mrb[44].mxu1 %v1258_v32 }
 0x5ac   :  { %2771 = vmatpush3.bf16.msra.mxu0 %v3661_v17  ;;  %2791 = vmatpush3.bf16.msra.mxu1 %v3667_v18 }
 0x5ad   :  { %2772 = vmatprep.subr.bf16.mxu0 %v3124_v0  ;;  %2792 = vmatprep.subr.bf16.mxu1 %v3124_v0 }
 0x5ae   :  { %2786 = vmatprep.mubr.msk.bf16.mxu0 %vm3125_vm0, %v3124_v0  ;;  %2806 = vmatprep.mubr.msk.bf16.mxu1 %vm3125_vm0, %v3124_v0 }
 0x5b0   :  { %2773 = vmatpush3.bf16.msra.mxu0 %v3679_v20  ;;  %2793 = vmatpush3.bf16.msra.mxu1 %v3685_v21 }
 0x5b1   :  { %2774 = vmatprep.subr.bf16.mxu0 %v3124_v0  ;;  %2794 = vmatprep.subr.bf16.mxu1 %v3124_v0 }
 0x5b4   :  { %2775 = vmatpush3.bf16.msra.mxu0 %v3693_v22  ;;  %2795 = vmatpush3.bf16.msra.mxu1 %v3699_v53 }
 0x5b5   :  { %2776 = vmatprep.subr.bf16.mxu0 %v3124_v0  ;;  %2796 = vmatprep.subr.bf16.mxu1 %v3124_v0 }
 0x5b8   :  { %2777 = vmatpush3.bf16.msra.mxu0 %v3707_v6  ;;  %2797 = vmatpush3.bf16.msra.mxu1 %v3713_v7 }
 0x5b9   :  { %2778 = vmatprep.subr.bf16.mxu0 %v3124_v0  ;;  %2798 = vmatprep.subr.bf16.mxu1 %v3124_v0 }
 0x5bc   :  { %2779 = vmatpush3.bf16.msra.mxu0 %v3837_v23  ;;  %2799 = vmatpush3.bf16.msra.mxu1 %v3843_v24 }
 0x5bd   :  { %2780 = vmatprep.subr.bf16.mxu0 %v3124_v0  ;;  %2800 = vmatprep.subr.bf16.mxu1 %v3124_v0 }
 0x5c0   :  { %2781 = vmatpush3.bf16.msra.mxu0 %v3851_v25  ;;  %2801 = vmatpush3.bf16.msra.mxu1 %v3857_v26 }
 0x5c1   :  { %2782 = vmatprep.subr.bf16.mxu0 %v3124_v0  ;;  %2802 = vmatprep.subr.bf16.mxu1 %v3124_v0 }
 0x5c4   :  { %2783 = vmatpush3.bf16.msra.mxu0 %v3865_v27  ;;  %2803 = vmatpush3.bf16.msra.mxu1 %v3871_v28 }
 0x5c5   :  { %2784 = vmatprep.subr.bf16.mxu0 %v3124_v0  ;;  %2804 = vmatprep.subr.bf16.mxu1 %v3124_v0 }
 0x5c8   :  { %2785 = vmatpush3.bf16.msra.mxu0 %v3879_v29  ;;  %2805 = vmatpush3.bf16.msra.mxu1 %v3885_v30 }
 0x5c9   :  { %2810 = vmatprep.subr.bf16.mxu0 %v3124_v0  ;;  %2830 = vmatprep.subr.bf16.mxu1 %v3124_v0 }
 0x65e   :  { %v1300_v62 = vpop.f32.mrb[40].mxu0  ;;  %v1341_v63 = vpop.f32.mrb[40].mxu1 }
 0x65f   :  { %v2708_v19 = vpop.f32.mrb[41].mxu0  ;;  %v2728_v34 = vpop.f32.mrb[41].mxu1  ;;  %v1347_v42 = vadd.f32 %v1979_v39, %v1341_v63  ;;  %v1306_v43 = vadd.f32 %v1978_v41, %v1300_v62 }
 0x660   :  { %v1303_v35 = vpop.f32.mrb[42].mxu0  ;;  %v1344_v36 = vpop.f32.mrb[42].mxu1 }
 0x661   :  { %v2709_v37 = vpop.f32.mrb[43].mxu0  ;;  %v2729_v38 = vpop.f32.mrb[43].mxu1  ;;  %v1983_v44 = vmul.f32 -1.442695, %v1347_v42  ;;  %v1982_v45 = vmul.f32 -1.442695, %v1306_v43 }
 0x663   :  { %3044 = vpow2.f32 %v1983_v44 }
 0x664   :  { %3046 = vpow2.f32 %v1982_v45 }
 0x66d   :  { %v3045_v46 = vpop.eup %3044 }
 0x66e   :  { %v3047_v47 = vpop.eup %3046  ;;  %v1439_v48 = vadd.f32 1.0, %v3045_v46  ;;  %v1988_v46 = vld [vmem:[%s4203_s0 + $0xd0] sm:$0xff] }
 0x66f   :  { %v1433_v49 = vadd.f32 1.0, %v3047_v47  ;;  %v1989_v47 = vld [vmem:[%s4203_s0 + $0xd8] sm:$0xff] }
 0x670   :  { %3048 = vrcp.f32 %v1439_v48 }
 0x671   :  { %3050 = vrcp.f32 %v1433_v49 }
 0x67a   :  { %v3049_v63 = vpop.eup %3048 }
 0x67b   :  { %v3051_v19 = vpop.eup %3050  ;;  %v1449_v35 = vmul.f32 %v3049_v63, %v3903_v2 }
 0x67e   :  { %v1382_v52 = vpop.f32.mrb[44].mxu0  ;;  %v1423_v54 = vpop.f32.mrb[44].mxu1 }
 0x67f   :  { %v1388_v55 = vadd.f32 %v1980_v50, %v1382_v52  ;;  %v1429_v56 = vadd.f32 %v1981_v51, %v1423_v54  ;;  %v2748_v1 = vpop.f32.mrb[45].mxu0  ;;  %v2768_v3 = vpop.f32.mrb[45].mxu1 }
 0x680   :  { %v1385_v4 = vpop.f32.mrb[46].mxu0  ;;  %v1426_v5 = vpop.f32.mrb[46].mxu1 }
 0x681   :  { %3052 = vtanh.f32 %v1388_v55  ;;  %v1984_v31 = vmul.f32 -1.442695, %v1429_v56  ;;  %v2749_v32 = vpop.f32.mrb[47].mxu0  ;;  %v2769_v62 = vpop.f32.mrb[47].mxu1 }
 0x683   :  { %3054 = vpow2.f32 %v1984_v31 }
 0x68b   :  { %v3053_v34 = vpop.eup %3052 }
 0x68c   :  { %v1450_v36 = vmul.f32 %v3053_v34, %v3051_v19 }
 0x68d   :  { %v3055_v37 = vpop.eup %3054 }
 0x68e   :  { %v4049_v38 = vadd.f32 %v1450_v36, %v1449_v35  ;;  %v1446_v39 = vadd.f32 1.0, %v3055_v37 }
 0x690   :  { %3056 = vtanh.f32 %v4049_v38 }
 0x691   :  { %3058 = vrcp.f32 %v1446_v39 }
 0x69a   :  { %v3057_v41 = vpop.eup %3056 }
 0x69b   :  { %v3059_v42 = vpop.eup %3058 }
 0x69c   :  { %v1453_v43 = vmul.f32 %v3059_v42, %v3057_v41  ;;  %v1996_v42 = vld [vmem:[%s4203_s0 + $0xf0] sm:$0xff] }
 0x69e   :  { %v1454_v44 = vpack.c.bf16 %v1453_v43, %v1453_v43  ;;  %v1997_v43 = vld [vmem:[%s4203_s0 + $0xf8] sm:$0xff] }
 0x6a0   :  { %1985 = vst [vmem:[%s4204_s2 + $0x14] sm:$0xf] %v1454_v44  ;;  %2787 = vmatmul.mubr.bf16.vlgmr.msra.gmra.mrb[48].mxu0 %v1454_v44  ;;  %2807 = vmatmul.mubr.bf16.vlgmr.msra.gmra.mrb[48].mxu1 %v1454_v44 }
 0x6a1   :  { %2811 = vmatpush3.bf16.msra.mxu0 %v3756_v58  ;;  %2831 = vmatpush3.bf16.msra.mxu1 %v3762_v9 }
 0x6a2   :  { %2812 = vmatprep.subr.bf16.mxu0 %v3124_v0  ;;  %2832 = vmatprep.subr.bf16.mxu1 %v3124_v0 }
 0x6a3   :  { %2826 = vmatprep.mubr.msk.bf16.mxu0 %vm3125_vm0, %v3124_v0  ;;  %2846 = vmatprep.mubr.msk.bf16.mxu1 %vm3125_vm0, %v3124_v0 }
 0x6a5   :  { %2813 = vmatpush3.bf16.msra.mxu0 %v3774_v10  ;;  %2833 = vmatpush3.bf16.msra.mxu1 %v3780_v11 }
 0x6a6   :  { %2814 = vmatprep.subr.bf16.mxu0 %v3124_v0  ;;  %2834 = vmatprep.subr.bf16.mxu1 %v3124_v0 }
 0x6a9   :  { %2815 = vmatpush3.bf16.msra.mxu0 %v3788_v12  ;;  %2835 = vmatpush3.bf16.msra.mxu1 %v3925_v57 }
 0x6aa   :  { %2816 = vmatprep.subr.bf16.mxu0 %v3124_v0  ;;  %2836 = vmatprep.subr.bf16.mxu1 %v3124_v0 }
 0x6ad   :  { %2817 = vmatpush3.bf16.msra.mxu0 %v3933_v33  ;;  %2837 = vmatpush3.bf16.msra.mxu1 %v3939_v8 }
 0x6ae   :  { %2818 = vmatprep.subr.bf16.mxu0 %v3124_v0  ;;  %2838 = vmatprep.subr.bf16.mxu1 %v3124_v0 }
 0x6b1   :  { %2819 = vmatpush3.bf16.msra.mxu0 %v3947_v13  ;;  %2839 = vmatpush3.bf16.msra.mxu1 %v3953_v40 }
 0x6b2   :  { %2820 = vmatprep.subr.bf16.mxu0 %v3124_v0  ;;  %2840 = vmatprep.subr.bf16.mxu1 %v3124_v0 }
 0x6b5   :  { %2821 = vmatpush3.bf16.msra.mxu0 %v3961_v14  ;;  %2841 = vmatpush3.bf16.msra.mxu1 %v3967_v59 }
 0x6b6   :  { %2822 = vmatprep.subr.bf16.mxu0 %v3124_v0  ;;  %2842 = vmatprep.subr.bf16.mxu1 %v3124_v0 }
 0x6b9   :  { %2823 = vmatpush3.bf16.msra.mxu0 %v3975_v15  ;;  %2843 = vmatpush3.bf16.msra.mxu1 %v3981_v16 }
 0x6ba   :  { %2824 = vmatprep.subr.bf16.mxu0 %v3124_v0  ;;  %2844 = vmatprep.subr.bf16.mxu1 %v3124_v0 }
 0x6bd   :  { %2825 = vmatpush3.bf16.msra.mxu0 %v3989_v60  ;;  %2845 = vmatpush3.bf16.msra.mxu1 %v3995_v61 }
 0x6be   :  { %2850 = vmatprep.subr.bf16.mxu0 %v3124_v0  ;;  %2870 = vmatprep.subr.bf16.mxu1 %v3124_v0 }
 0x6c0   :  { %2827 = vmatmul.mubr.bf16.vlgmr.msra.gmra.mrb[52].mxu0 %v1454_v44  ;;  %2847 = vmatmul.mubr.bf16.vlgmr.msra.gmra.mrb[52].mxu1 %v1454_v44 }
 0x6c1   :  { %2851 = vmatpush3.bf16.msra.mxu0 %v3661_v17  ;;  %2871 = vmatpush3.bf16.msra.mxu1 %v3667_v18 }
 0x6c2   :  { %2852 = vmatprep.subr.bf16.mxu0 %v3124_v0  ;;  %2872 = vmatprep.subr.bf16.mxu1 %v3124_v0 }
 0x6c3   :  { %2866 = vmatprep.mubr.msk.bf16.mxu0 %vm3125_vm0, %v3124_v0  ;;  %2886 = vmatprep.mubr.msk.bf16.mxu1 %vm3125_vm0, %v3124_v0 }
 0x6c5   :  { %2853 = vmatpush3.bf16.msra.mxu0 %v3679_v20  ;;  %2873 = vmatpush3.bf16.msra.mxu1 %v3685_v21 }
 0x6c6   :  { %2854 = vmatprep.subr.bf16.mxu0 %v3124_v0  ;;  %2874 = vmatprep.subr.bf16.mxu1 %v3124_v0 }
 0x6c9   :  { %2855 = vmatpush3.bf16.msra.mxu0 %v3693_v22  ;;  %2875 = vmatpush3.bf16.msra.mxu1 %v3699_v53 }
 0x6ca   :  { %2856 = vmatprep.subr.bf16.mxu0 %v3124_v0  ;;  %2876 = vmatprep.subr.bf16.mxu1 %v3124_v0 }
 0x6cd   :  { %2857 = vmatpush3.bf16.msra.mxu0 %v3707_v6  ;;  %2877 = vmatpush3.bf16.msra.mxu1 %v3713_v7 }
 0x6ce   :  { %2858 = vmatprep.subr.bf16.mxu0 %v3124_v0  ;;  %2878 = vmatprep.subr.bf16.mxu1 %v3124_v0 }
 0x6d1   :  { %2859 = vmatpush3.bf16.msra.mxu0 %v3837_v23  ;;  %2879 = vmatpush3.bf16.msra.mxu1 %v3843_v24  ;;  %v1987_v23 = vld [vmem:[%s4203_s0 + $0xc8] sm:$0xff]  ;;  %v1986_v24 = vld [vmem:[%s4203_s0 + $0xc0] sm:$0xff] }
 0x6d2   :  { %2860 = vmatprep.subr.bf16.mxu0 %v3124_v0  ;;  %2880 = vmatprep.subr.bf16.mxu1 %v3124_v0 }
 0x6d5   :  { %2861 = vmatpush3.bf16.msra.mxu0 %v3851_v25  ;;  %2881 = vmatpush3.bf16.msra.mxu1 %v3857_v26 }
 0x6d6   :  { %2862 = vmatprep.subr.bf16.mxu0 %v3124_v0  ;;  %2882 = vmatprep.subr.bf16.mxu1 %v3124_v0 }
 0x6d9   :  { %2863 = vmatpush3.bf16.msra.mxu0 %v3865_v27  ;;  %2883 = vmatpush3.bf16.msra.mxu1 %v3871_v28 }
 0x6da   :  { %2864 = vmatprep.subr.bf16.mxu0 %v3124_v0  ;;  %2884 = vmatprep.subr.bf16.mxu1 %v3124_v0 }
 0x6dd   :  { %2865 = vmatpush3.bf16.msra.mxu0 %v3879_v29  ;;  %2885 = vmatpush3.bf16.msra.mxu1 %v3885_v30 }
 0x6de   :  { %2890 = vmatprep.subr.bf16.mxu0 %v3124_v0  ;;  %2910 = vmatprep.subr.bf16.mxu1 %v3124_v0 }
 0x773   :  { %v1496_v17 = vpop.f32.mrb[48].mxu0  ;;  %v1537_v18 = vpop.f32.mrb[48].mxu1 }
 0x774   :  { %v2788_v20 = vpop.f32.mrb[49].mxu0  ;;  %v2808_v21 = vpop.f32.mrb[49].mxu1  ;;  %v1543_v25 = vadd.f32 %v1987_v23, %v1537_v18  ;;  %v1502_v26 = vadd.f32 %v1986_v24, %v1496_v17 }
 0x775   :  { %v1499_v22 = vpop.f32.mrb[50].mxu0  ;;  %v1540_v53 = vpop.f32.mrb[50].mxu1 }
 0x776   :  { %v2789_v6 = vpop.f32.mrb[51].mxu0  ;;  %v2809_v7 = vpop.f32.mrb[51].mxu1  ;;  %v1991_v27 = vmul.f32 -1.442695, %v1543_v25  ;;  %v1990_v28 = vmul.f32 -1.442695, %v1502_v26 }
 0x778   :  { %3060 = vpow2.f32 %v1991_v27 }
 0x779   :  { %3062 = vpow2.f32 %v1990_v28 }
 0x782   :  { %v3061_v29 = vpop.eup %3060 }
 0x783   :  { %v3063_v30 = vpop.eup %3062  ;;  %v1635_v2 = vadd.f32 1.0, %v3061_v29 }
 0x784   :  { %v1629_v45 = vadd.f32 1.0, %v3063_v30 }
 0x785   :  { %3064 = vrcp.f32 %v1635_v2 }
 0x786   :  { %3066 = vrcp.f32 %v1629_v45 }
 0x78f   :  { %v3065_v5 = vpop.eup %3064 }
 0x790   :  { %v3067_v31 = vpop.eup %3066  ;;  %v1645_v62 = vmul.f32 %v3065_v5, %v4049_v38 }
 0x793   :  { %v1578_v48 = vpop.f32.mrb[52].mxu0  ;;  %v1619_v49 = vpop.f32.mrb[52].mxu1 }
 0x794   :  { %v1584_v50 = vadd.f32 %v1988_v46, %v1578_v48  ;;  %v1625_v51 = vadd.f32 %v1989_v47, %v1619_v49  ;;  %v2828_v52 = vpop.f32.mrb[53].mxu0  ;;  %v2848_v54 = vpop.f32.mrb[53].mxu1 }
 0x795   :  { %v1581_v55 = vpop.f32.mrb[54].mxu0  ;;  %v1622_v56 = vpop.f32.mrb[54].mxu1 }
 0x796   :  { %3068 = vtanh.f32 %v1584_v50  ;;  %v1992_v1 = vmul.f32 -1.442695, %v1625_v51  ;;  %v2829_v3 = vpop.f32.mrb[55].mxu0  ;;  %v2849_v4 = vpop.f32.mrb[55].mxu1 }
 0x798   :  { %3070 = vpow2.f32 %v1992_v1 }
 0x7a0   :  { %v3069_v32 = vpop.eup %3068 }
 0x7a1   :  { %v1646_v63 = vmul.f32 %v3069_v32, %v3067_v31 }
 0x7a2   :  { %v3071_v19 = vpop.eup %3070 }
 0x7a3   :  { %v4140_v34 = vadd.f32 %v1646_v63, %v1645_v62  ;;  %v1642_v35 = vadd.f32 1.0, %v3071_v19 }
 0x7a5   :  { %3072 = vtanh.f32 %v4140_v34 }
 0x7a6   :  { %3074 = vrcp.f32 %v1642_v35 }
 0x7af   :  { %v3073_v36 = vpop.eup %3072 }
 0x7b0   :  { %v3075_v37 = vpop.eup %3074 }
 0x7b1   :  { %v1649_v39 = vmul.f32 %v3075_v37, %v3073_v36 }
 0x7b3   :  { %v1650_v41 = vpack.c.bf16 %v1649_v39, %v1649_v39 }
 0x7b5   :  { %1993 = vst [vmem:[%s4204_s2 + $0x18] sm:$0xf] %v1650_v41  ;;  %2867 = vmatmul.mubr.bf16.vlgmr.msra.gmra.mrb[56].mxu0 %v1650_v41  ;;  %2887 = vmatmul.mubr.bf16.vlgmr.msra.gmra.mrb[56].mxu1 %v1650_v41 }
 0x7b6   :  { %2891 = vmatpush3.bf16.msra.mxu0 %v3756_v58  ;;  %2911 = vmatpush3.bf16.msra.mxu1 %v3762_v9 }
 0x7b7   :  { %2892 = vmatprep.subr.bf16.mxu0 %v3124_v0  ;;  %2912 = vmatprep.subr.bf16.mxu1 %v3124_v0 }
 0x7b8   :  { %2906 = vmatprep.mubr.msk.bf16.mxu0 %vm3125_vm0, %v3124_v0  ;;  %2926 = vmatprep.mubr.msk.bf16.mxu1 %vm3125_vm0, %v3124_v0 }
 0x7ba   :  { %2893 = vmatpush3.bf16.msra.mxu0 %v3774_v10  ;;  %2913 = vmatpush3.bf16.msra.mxu1 %v3780_v11 }
 0x7bb   :  { %2894 = vmatprep.subr.bf16.mxu0 %v3124_v0  ;;  %2914 = vmatprep.subr.bf16.mxu1 %v3124_v0 }
 0x7be   :  { %2895 = vmatpush3.bf16.msra.mxu0 %v3788_v12  ;;  %2915 = vmatpush3.bf16.msra.mxu1 %v3925_v57 }
 0x7bf   :  { %2896 = vmatprep.subr.bf16.mxu0 %v3124_v0  ;;  %2916 = vmatprep.subr.bf16.mxu1 %v3124_v0 }
 0x7c2   :  { %2897 = vmatpush3.bf16.msra.mxu0 %v3933_v33  ;;  %2917 = vmatpush3.bf16.msra.mxu1 %v3939_v8 }
 0x7c3   :  { %2898 = vmatprep.subr.bf16.mxu0 %v3124_v0  ;;  %2918 = vmatprep.subr.bf16.mxu1 %v3124_v0 }
 0x7c6   :  { %2899 = vmatpush3.bf16.msra.mxu0 %v3947_v13  ;;  %2919 = vmatpush3.bf16.msra.mxu1 %v3953_v40  ;;  %v1995_v13 = vld [vmem:[%s4203_s0 + $0xe8] sm:$0xff] }
 0x7c7   :  { %2900 = vmatprep.subr.bf16.mxu0 %v3124_v0  ;;  %2920 = vmatprep.subr.bf16.mxu1 %v3124_v0 }
 0x7ca   :  { %2901 = vmatpush3.bf16.msra.mxu0 %v3961_v14  ;;  %2921 = vmatpush3.bf16.msra.mxu1 %v3967_v59 }
 0x7cb   :  { %2902 = vmatprep.subr.bf16.mxu0 %v3124_v0  ;;  %2922 = vmatprep.subr.bf16.mxu1 %v3124_v0 }
 0x7ce   :  { %2903 = vmatpush3.bf16.msra.mxu0 %v3975_v15  ;;  %2923 = vmatpush3.bf16.msra.mxu1 %v3981_v16 }
 0x7cf   :  { %2904 = vmatprep.subr.bf16.mxu0 %v3124_v0  ;;  %2924 = vmatprep.subr.bf16.mxu1 %v3124_v0  ;;  %v1994_v0 = vld [vmem:[%s4203_s0 + $0xe0] sm:$0xff] }
 0x7d2   :  { %2905 = vmatpush3.bf16.msra.mxu0 %v3989_v60  ;;  %2925 = vmatpush3.bf16.msra.mxu1 %v3995_v61 }
 0x7d5   :  { %2907 = vmatmul.mubr.bf16.vlgmr.msra.gmra.mrb[60].mxu0 %v1650_v41  ;;  %2927 = vmatmul.mubr.bf16.vlgmr.msra.gmra.mrb[60].mxu1 %v1650_v41 }
 0x888   :  { %v1692_v58 = vpop.f32.mrb[56].mxu0  ;;  %v1733_v9 = vpop.f32.mrb[56].mxu1 }
 0x889   :  { %v2868_v10 = vpop.f32.mrb[57].mxu0  ;;  %v2888_v11 = vpop.f32.mrb[57].mxu1  ;;  %v1739_v40 = vadd.f32 %v1995_v13, %v1733_v9  ;;  %v1698_v14 = vadd.f32 %v1994_v0, %v1692_v58 }
 0x88a   :  { %v1695_v12 = vpop.f32.mrb[58].mxu0  ;;  %v1736_v57 = vpop.f32.mrb[58].mxu1 }
 0x88b   :  { %v2869_v33 = vpop.f32.mrb[59].mxu0  ;;  %v2889_v8 = vpop.f32.mrb[59].mxu1  ;;  %v1999_v59 = vmul.f32 -1.442695, %v1739_v40  ;;  %v1998_v15 = vmul.f32 -1.442695, %v1698_v14 }
 0x88d   :  { %3076 = vpow2.f32 %v1999_v59 }
 0x88e   :  { %3078 = vpow2.f32 %v1998_v15 }
 0x897   :  { %v3077_v16 = vpop.eup %3076 }
 0x898   :  { %v3079_v60 = vpop.eup %3078  ;;  %v1831_v61 = vadd.f32 1.0, %v3077_v16 }
 0x899   :  { %v1825_v38 = vadd.f32 1.0, %v3079_v60 }
 0x89a   :  { %3080 = vrcp.f32 %v1831_v61 }
 0x89b   :  { %3082 = vrcp.f32 %v1825_v38 }
 0x8a4   :  { %v3081_v25 = vpop.eup %3080 }
 0x8a5   :  { %v3083_v26 = vpop.eup %3082  ;;  %v1841_v28 = vmul.f32 %v3081_v25, %v4140_v34 }
 0x8a8   :  { %v1774_v44 = vpop.f32.mrb[60].mxu0  ;;  %v1815_v17 = vpop.f32.mrb[60].mxu1 }
 0x8a9   :  { %v1780_v18 = vadd.f32 %v1996_v42, %v1774_v44  ;;  %v1821_v20 = vadd.f32 %v1997_v43, %v1815_v17  ;;  %v2908_v21 = vpop.f32.mrb[61].mxu0  ;;  %v2928_v22 = vpop.f32.mrb[61].mxu1 }
 0x8aa   :  { %v1777_v53 = vpop.f32.mrb[62].mxu0  ;;  %v1818_v6 = vpop.f32.mrb[62].mxu1 }
 0x8ab   :  { %3084 = vtanh.f32 %v1780_v18  ;;  %v2000_v7 = vmul.f32 -1.442695, %v1821_v20  ;;  %v2909_v23 = vpop.f32.mrb[63].mxu0  ;;  %v2929_v24 = vpop.f32.mrb[63].mxu1 }
 0x8ad   :  { %3086 = vpow2.f32 %v2000_v7 }
 0x8b5   :  { %v3085_v27 = vpop.eup %3084 }
 0x8b6   :  { %v1842_v29 = vmul.f32 %v3085_v27, %v3083_v26 }
 0x8b7   :  { %v3087_v30 = vpop.eup %3086 }
 0x8b8   :  { %v1843_v2 = vadd.f32 %v1842_v29, %v1841_v28  ;;  %v1838_v45 = vadd.f32 1.0, %v3087_v30 }
 0x8ba   :  { %3088 = vtanh.f32 %v1843_v2  ;;  %1850 = vst [vmem:[%s4205_s4] sm:$0xff] %v1843_v2 }
 0x8bb   :  { %3090 = vrcp.f32 %v1838_v45 }
 0x8c4   :  { %v3089_v46 = vpop.eup %3088 }
 0x8c5   :  { %v3091_v47 = vpop.eup %3090 }
 0x8c6   :  { %v1845_v48 = vmul.f32 %v3091_v47, %v3089_v46 }
 0x8c8   :  { %v1846_v49 = vpack.c.bf16 %v1845_v48, %v1845_v48  ;;  %1849 = vst [vmem:[%s4206_s3] sm:$0xff] %v1845_v48 }
 0x8ca   :  { %2001 = vst [vmem:[%s4204_s2 + $0x1c] sm:$0xf] %v1846_v49 }

</bundles_post_ra>
